<compile_context>
chip_gen: v5e
topology: v5e:2x2
jax: 0.10.0
libtpu: 0.0.40
codegen_flags: <defaults>
</compile_context>

<pallas_src>
import functools

import jax
import jax.numpy as jnp
from jax import lax
from jax.experimental import pallas as pl
from jax.experimental.pallas import tpu as pltpu


def _attention_kernel(x_ref, wq_ref, wkv_ref, wp_ref, bp_ref, o_ref, *,
                      num_heads, scale):
    """One batch element per grid step: fused q/kv proj + MHSA + out proj."""
    x = x_ref[0]                                            # (N, C) float32
    c = x.shape[1]
    hd = c // num_heads

    # q / kv projections (qkv_bias=False).  Weights are (in, out), so these
    # are plain x @ W MXU matmuls.
    q = jnp.dot(x, wq_ref[...], preferred_element_type=jnp.float32)    # (N, C)
    kv = jnp.dot(x, wkv_ref[...], preferred_element_type=jnp.float32)  # (N, 2C)
    k = kv[:, :c]
    v = kv[:, c:]

    # Multi-head attention: static unroll over heads, static lane slices.
    head_outs = []
    for h in range(num_heads):
        sl = slice(h * hd, (h + 1) * hd)
        qh, kh, vh = q[:, sl], k[:, sl], v[:, sl]           # (N, hd) each
        # scores = qh @ kh^T * scale   (contract the head dim directly,
        # no explicit transpose needed)
        s = lax.dot_general(qh, kh, (((1,), (1,)), ((), ())),
                            preferred_element_type=jnp.float32) * scale  # (N, N)
        s = s - jnp.max(s, axis=-1, keepdims=True)
        p = jnp.exp(s)
        p = p / jnp.sum(p, axis=-1, keepdims=True)          # softmax(dim=-1)
        # attn_drop has p=0.0 -> identity
        head_outs.append(jnp.dot(p, vh, preferred_element_type=jnp.float32))
    attn_out = jnp.concatenate(head_outs, axis=1)           # (N, C)

    # Output projection (nn.Linear with bias); proj_drop p=0.0 -> identity.
    out = jnp.dot(attn_out, wp_ref[...],
                  preferred_element_type=jnp.float32) + bp_ref[...]
    o_ref[0] = out.astype(o_ref.dtype)


def attention_forward(x, wq, wkv, wproj, bproj, *, num_heads):
    """x: (B, N, C) float32.

    wq: (C, C), wkv: (2C, C), wproj: (C, C) in PyTorch nn.Linear (out, in)
    layout; bproj: (C,).  Returns (B, N, C) float32.
    """
    B, N, C = x.shape
    head_dim = C // num_heads
    scale = head_dim ** -0.5

    # One-time transpose of tiny weight matrices to (in, out) layout so the
    # kernel does plain x @ W (no activation-sized transposes anywhere).
    wq_t = jnp.asarray(wq, jnp.float32).T          # (C, C)
    wkv_t = jnp.asarray(wkv, jnp.float32).T        # (C, 2C)
    wp_t = jnp.asarray(wproj, jnp.float32).T       # (C, C)
    bp = jnp.asarray(bproj, jnp.float32).reshape(1, C)

    kernel = functools.partial(_attention_kernel,
                               num_heads=num_heads, scale=scale)

    return pl.pallas_call(
        kernel,
        out_shape=jax.ShapeDtypeStruct((B, N, C), jnp.float32),
        grid=(B,),
        in_specs=[
            pl.BlockSpec((1, N, C), lambda b: (b, 0, 0)),       # x (per batch)
            pl.BlockSpec((C, C), lambda b: (0, 0)),             # Wq^T
            pl.BlockSpec((C, 2 * C), lambda b: (0, 0)),          # Wkv^T
            pl.BlockSpec((C, C), lambda b: (0, 0)),             # Wproj^T
            pl.BlockSpec((1, C), lambda b: (0, 0)),             # proj bias
        ],
        out_specs=pl.BlockSpec((1, N, C), lambda b: (b, 0, 0)),
        compiler_params=pltpu.CompilerParams(
            dimension_semantics=("parallel",)),
    )(jnp.asarray(x, jnp.float32), wq_t, wkv_t, wp_t, bp)


def _reference(x, wq, wkv, wproj, bproj, num_heads):
    """Pure-JAX forward matching the PyTorch module (default config)."""
    B, N, C = x.shape
    hd = C // num_heads
    scale = hd ** -0.5

    q = x @ wq.T                                   # (B, N, C)
    kv = x @ wkv.T                                 # (B, N, 2C)
    k, v = kv[..., :C], kv[..., C:]

    def split_heads(t):                            # (B, N, C) -> (B, H, N, hd)
        return t.reshape(B, N, num_heads, hd).transpose(0, 2, 1, 3)

    qh, kh, vh = split_heads(q), split_heads(k), split_heads(v)
    attn = jnp.einsum('bhqd,bhkd->bhqk', qh, kh) * scale
    attn = jax.nn.softmax(attn, axis=-1)
    o = jnp.einsum('bhqk,bhkd->bhqd', attn, vh)
    o = o.transpose(0, 2, 1, 3).reshape(B, N, C)
    return o @ wproj.T + bproj


if __name__ == "__main__":
    key = jax.random.PRNGKey(0)
    B, H, W = 2, 4, 4
    N = H * W                      # token count (forward takes x, H, W; with
    C, num_heads = 64, 8           # sr_ratio=1 H/W only define N = H*W)

    ks = jax.random.split(key, 5)
    x = jax.random.normal(ks[0], (B, N, C), jnp.float32)
    # PyTorch nn.Linear weight layout: (out_features, in_features)
    wq = jax.random.normal(ks[1], (C, C), jnp.float32) / jnp.sqrt(C)
    wkv = jax.random.normal(ks[2], (2 * C, C), jnp.float32) / jnp.sqrt(C)
    wproj = jax.random.normal(ks[3], (C, C), jnp.float32) / jnp.sqrt(C)
    bproj = 0.1 * jax.random.normal(ks[4], (C,), jnp.float32)

    out = attention_forward(x, wq, wkv, wproj, bproj, num_heads=num_heads)
    out = jax.block_until_ready(out)

    ref = _reference(x, wq, wkv, wproj, bproj, num_heads)
    assert out.shape == (B, N, C)
    # Tolerance covers MXU f32-via-bf16-pass differences between the Pallas
    # kernel and the XLA reference; real bugs produce O(1) errors.
    assert jnp.allclose(out, ref, rtol=2e-2, atol=2e-2), float(
        jnp.max(jnp.abs(out - ref)))
    print("KERNEL_OK")
</pallas_src>

<mosaic_0001>
module attributes {stable_mosaic.version = 11 : i64} {
  func.func @_attention_kernel(%arg0: i32, %arg1: memref<1x16x64xf32, #tpu.memory_space<vmem>>, %arg2: memref<64x64xf32, #tpu.memory_space<vmem>>, %arg3: memref<64x128xf32, #tpu.memory_space<vmem>>, %arg4: memref<64x64xf32, #tpu.memory_space<vmem>>, %arg5: memref<1x64xf32, #tpu.memory_space<vmem>>, %arg6: memref<1x16x64xf32, #tpu.memory_space<vmem>>) attributes {dimension_semantics = [#tpu.dimension_semantics<parallel>], iteration_bounds = array<i64: 2>, scalar_prefetch = 0 : i64, scratch_operands = 0 : i64, tpu.core_type = #tpu.core_type<tc>, window_params = [{transform_indices = @transform_0, window_bounds = array<i64: 1, 16, 64>}, {pipeline_mode = #tpu.pipeline_mode<synchronous>, transform_indices = @transform_1, window_bounds = array<i64: 64, 64>}, {pipeline_mode = #tpu.pipeline_mode<synchronous>, transform_indices = @transform_2, window_bounds = array<i64: 64, 128>}, {pipeline_mode = #tpu.pipeline_mode<synchronous>, transform_indices = @transform_3, window_bounds = array<i64: 64, 64>}, {pipeline_mode = #tpu.pipeline_mode<synchronous>, transform_indices = @transform_4, window_bounds = array<i64: 1, 64>}, {transform_indices = @transform_5, window_bounds = array<i64: 1, 16, 64>}]} {
    %c0 = arith.constant 0 : index
    %c0_0 = arith.constant 0 : index
    %c0_1 = arith.constant 0 : index
    %0 = vector.load %arg1[%c0, %c0_0, %c0_1] : memref<1x16x64xf32, #tpu.memory_space<vmem>>, vector<1x16x64xf32>
    %1 = vector.shape_cast %0 : vector<1x16x64xf32> to vector<16x64xf32>
    %c0_2 = arith.constant 0 : index
    %c0_3 = arith.constant 0 : index
    %2 = vector.load %arg2[%c0_2, %c0_3] : memref<64x64xf32, #tpu.memory_space<vmem>>, vector<64x64xf32>
    %cst = arith.constant dense<0.000000e+00> : vector<16x64xf32>
    %3 = tpu.matmul %1, %2, %cst {dimension_numbers = #tpu.dot_dimension_numbers<[1], [0], [0], [1], [0, 0, 1, 1], [], []>} : vector<16x64xf32>, vector<64x64xf32>, vector<16x64xf32> -> vector<16x64xf32>
    %c0_4 = arith.constant 0 : index
    %c0_5 = arith.constant 0 : index
    %4 = vector.load %arg3[%c0_4, %c0_5] : memref<64x128xf32, #tpu.memory_space<vmem>>, vector<64x128xf32>
    %cst_6 = arith.constant dense<0.000000e+00> : vector<16x128xf32>
    %5 = tpu.matmul %1, %4, %cst_6 {dimension_numbers = #tpu.dot_dimension_numbers<[1], [0], [0], [1], [0, 0, 1, 1], [], []>} : vector<16x64xf32>, vector<64x128xf32>, vector<16x128xf32> -> vector<16x128xf32>
    %6 = vector.extract_strided_slice %5 {offsets = [0, 0], sizes = [16, 64], strides = [1, 1]} : vector<16x128xf32> to vector<16x64xf32>
    %7 = vector.extract_strided_slice %5 {offsets = [0, 64], sizes = [16, 64], strides = [1, 1]} : vector<16x128xf32> to vector<16x64xf32>
    %8 = vector.extract_strided_slice %3 {offsets = [0, 0], sizes = [16, 8], strides = [1, 1]} : vector<16x64xf32> to vector<16x8xf32>
    %9 = vector.extract_strided_slice %6 {offsets = [0, 0], sizes = [16, 8], strides = [1, 1]} : vector<16x64xf32> to vector<16x8xf32>
    %10 = vector.extract_strided_slice %7 {offsets = [0, 0], sizes = [16, 8], strides = [1, 1]} : vector<16x64xf32> to vector<16x8xf32>
    %cst_7 = arith.constant dense<0.000000e+00> : vector<16x16xf32>
    %11 = tpu.matmul %8, %9, %cst_7 {dimension_numbers = #tpu.dot_dimension_numbers<[1], [1], [0], [0], [0, 0, 1, 0], [], []>} : vector<16x8xf32>, vector<16x8xf32>, vector<16x16xf32> -> vector<16x16xf32>
    %cst_8 = arith.constant 0.353553385 : f32
    %12 = vector.broadcast %cst_8 : f32 to vector<16x16xf32>
    %13 = arith.mulf %11, %12 : vector<16x16xf32>
    %cst_9 = arith.constant dense<0xFF800000> : vector<16xf32>
    %14 = vector.multi_reduction <maximumf>, %13, %cst_9 [1] : vector<16x16xf32> to vector<16xf32>
    %15 = vector.shape_cast %14 : vector<16xf32> to vector<16x1xf32>
    %16 = vector.broadcast %15 : vector<16x1xf32> to vector<16x16xf32>
    %17 = arith.subf %13, %16 : vector<16x16xf32>
    %18 = math.exp %17 : vector<16x16xf32>
    %cst_10 = arith.constant dense<0.000000e+00> : vector<16xf32>
    %19 = vector.multi_reduction <add>, %18, %cst_10 [1] : vector<16x16xf32> to vector<16xf32>
    %20 = vector.shape_cast %19 : vector<16xf32> to vector<16x1xf32>
    %21 = vector.broadcast %20 : vector<16x1xf32> to vector<16x16xf32>
    %22 = arith.divf %18, %21 : vector<16x16xf32>
    %cst_11 = arith.constant dense<0.000000e+00> : vector<16x8xf32>
    %23 = tpu.matmul %22, %10, %cst_11 {dimension_numbers = #tpu.dot_dimension_numbers<[1], [0], [0], [1], [0, 0, 1, 1], [], []>} : vector<16x16xf32>, vector<16x8xf32>, vector<16x8xf32> -> vector<16x8xf32>
    %24 = vector.extract_strided_slice %3 {offsets = [0, 8], sizes = [16, 8], strides = [1, 1]} : vector<16x64xf32> to vector<16x8xf32>
    %25 = vector.extract_strided_slice %6 {offsets = [0, 8], sizes = [16, 8], strides = [1, 1]} : vector<16x64xf32> to vector<16x8xf32>
    %26 = vector.extract_strided_slice %7 {offsets = [0, 8], sizes = [16, 8], strides = [1, 1]} : vector<16x64xf32> to vector<16x8xf32>
    %cst_12 = arith.constant dense<0.000000e+00> : vector<16x16xf32>
    %27 = tpu.matmul %24, %25, %cst_12 {dimension_numbers = #tpu.dot_dimension_numbers<[1], [1], [0], [0], [0, 0, 1, 0], [], []>} : vector<16x8xf32>, vector<16x8xf32>, vector<16x16xf32> -> vector<16x16xf32>
    %cst_13 = arith.constant 0.353553385 : f32
    %28 = vector.broadcast %cst_13 : f32 to vector<16x16xf32>
    %29 = arith.mulf %27, %28 : vector<16x16xf32>
    %cst_14 = arith.constant dense<0xFF800000> : vector<16xf32>
    %30 = vector.multi_reduction <maximumf>, %29, %cst_14 [1] : vector<16x16xf32> to vector<16xf32>
    %31 = vector.shape_cast %30 : vector<16xf32> to vector<16x1xf32>
    %32 = vector.broadcast %31 : vector<16x1xf32> to vector<16x16xf32>
    %33 = arith.subf %29, %32 : vector<16x16xf32>
    %34 = math.exp %33 : vector<16x16xf32>
    %cst_15 = arith.constant dense<0.000000e+00> : vector<16xf32>
    %35 = vector.multi_reduction <add>, %34, %cst_15 [1] : vector<16x16xf32> to vector<16xf32>
    %36 = vector.shape_cast %35 : vector<16xf32> to vector<16x1xf32>
    %37 = vector.broadcast %36 : vector<16x1xf32> to vector<16x16xf32>
    %38 = arith.divf %34, %37 : vector<16x16xf32>
    %cst_16 = arith.constant dense<0.000000e+00> : vector<16x8xf32>
    %39 = tpu.matmul %38, %26, %cst_16 {dimension_numbers = #tpu.dot_dimension_numbers<[1], [0], [0], [1], [0, 0, 1, 1], [], []>} : vector<16x16xf32>, vector<16x8xf32>, vector<16x8xf32> -> vector<16x8xf32>
    %40 = vector.extract_strided_slice %3 {offsets = [0, 16], sizes = [16, 8], strides = [1, 1]} : vector<16x64xf32> to vector<16x8xf32>
    %41 = vector.extract_strided_slice %6 {offsets = [0, 16], sizes = [16, 8], strides = [1, 1]} : vector<16x64xf32> to vector<16x8xf32>
    %42 = vector.extract_strided_slice %7 {offsets = [0, 16], sizes = [16, 8], strides = [1, 1]} : vector<16x64xf32> to vector<16x8xf32>
    %cst_17 = arith.constant dense<0.000000e+00> : vector<16x16xf32>
    %43 = tpu.matmul %40, %41, %cst_17 {dimension_numbers = #tpu.dot_dimension_numbers<[1], [1], [0], [0], [0, 0, 1, 0], [], []>} : vector<16x8xf32>, vector<16x8xf32>, vector<16x16xf32> -> vector<16x16xf32>
    %cst_18 = arith.constant 0.353553385 : f32
    %44 = vector.broadcast %cst_18 : f32 to vector<16x16xf32>
    %45 = arith.mulf %43, %44 : vector<16x16xf32>
    %cst_19 = arith.constant dense<0xFF800000> : vector<16xf32>
    %46 = vector.multi_reduction <maximumf>, %45, %cst_19 [1] : vector<16x16xf32> to vector<16xf32>
    %47 = vector.shape_cast %46 : vector<16xf32> to vector<16x1xf32>
    %48 = vector.broadcast %47 : vector<16x1xf32> to vector<16x16xf32>
    %49 = arith.subf %45, %48 : vector<16x16xf32>
    %50 = math.exp %49 : vector<16x16xf32>
    %cst_20 = arith.constant dense<0.000000e+00> : vector<16xf32>
    %51 = vector.multi_reduction <add>, %50, %cst_20 [1] : vector<16x16xf32> to vector<16xf32>
    %52 = vector.shape_cast %51 : vector<16xf32> to vector<16x1xf32>
    %53 = vector.broadcast %52 : vector<16x1xf32> to vector<16x16xf32>
    %54 = arith.divf %50, %53 : vector<16x16xf32>
    %cst_21 = arith.constant dense<0.000000e+00> : vector<16x8xf32>
    %55 = tpu.matmul %54, %42, %cst_21 {dimension_numbers = #tpu.dot_dimension_numbers<[1], [0], [0], [1], [0, 0, 1, 1], [], []>} : vector<16x16xf32>, vector<16x8xf32>, vector<16x8xf32> -> vector<16x8xf32>
    %56 = vector.extract_strided_slice %3 {offsets = [0, 24], sizes = [16, 8], strides = [1, 1]} : vector<16x64xf32> to vector<16x8xf32>
    %57 = vector.extract_strided_slice %6 {offsets = [0, 24], sizes = [16, 8], strides = [1, 1]} : vector<16x64xf32> to vector<16x8xf32>
    %58 = vector.extract_strided_slice %7 {offsets = [0, 24], sizes = [16, 8], strides = [1, 1]} : vector<16x64xf32> to vector<16x8xf32>
    %cst_22 = arith.constant dense<0.000000e+00> : vector<16x16xf32>
    %59 = tpu.matmul %56, %57, %cst_22 {dimension_numbers = #tpu.dot_dimension_numbers<[1], [1], [0], [0], [0, 0, 1, 0], [], []>} : vector<16x8xf32>, vector<16x8xf32>, vector<16x16xf32> -> vector<16x16xf32>
    %cst_23 = arith.constant 0.353553385 : f32
    %60 = vector.broadcast %cst_23 : f32 to vector<16x16xf32>
    %61 = arith.mulf %59, %60 : vector<16x16xf32>
    %cst_24 = arith.constant dense<0xFF800000> : vector<16xf32>
    %62 = vector.multi_reduction <maximumf>, %61, %cst_24 [1] : vector<16x16xf32> to vector<16xf32>
    %63 = vector.shape_cast %62 : vector<16xf32> to vector<16x1xf32>
    %64 = vector.broadcast %63 : vector<16x1xf32> to vector<16x16xf32>
    %65 = arith.subf %61, %64 : vector<16x16xf32>
    %66 = math.exp %65 : vector<16x16xf32>
    %cst_25 = arith.constant dense<0.000000e+00> : vector<16xf32>
    %67 = vector.multi_reduction <add>, %66, %cst_25 [1] : vector<16x16xf32> to vector<16xf32>
    %68 = vector.shape_cast %67 : vector<16xf32> to vector<16x1xf32>
    %69 = vector.broadcast %68 : vector<16x1xf32> to vector<16x16xf32>
    %70 = arith.divf %66, %69 : vector<16x16xf32>
    %cst_26 = arith.constant dense<0.000000e+00> : vector<16x8xf32>
    %71 = tpu.matmul %70, %58, %cst_26 {dimension_numbers = #tpu.dot_dimension_numbers<[1], [0], [0], [1], [0, 0, 1, 1], [], []>} : vector<16x16xf32>, vector<16x8xf32>, vector<16x8xf32> -> vector<16x8xf32>
    %72 = vector.extract_strided_slice %3 {offsets = [0, 32], sizes = [16, 8], strides = [1, 1]} : vector<16x64xf32> to vector<16x8xf32>
    %73 = vector.extract_strided_slice %6 {offsets = [0, 32], sizes = [16, 8], strides = [1, 1]} : vector<16x64xf32> to vector<16x8xf32>
    %74 = vector.extract_strided_slice %7 {offsets = [0, 32], sizes = [16, 8], strides = [1, 1]} : vector<16x64xf32> to vector<16x8xf32>
    %cst_27 = arith.constant dense<0.000000e+00> : vector<16x16xf32>
    %75 = tpu.matmul %72, %73, %cst_27 {dimension_numbers = #tpu.dot_dimension_numbers<[1], [1], [0], [0], [0, 0, 1, 0], [], []>} : vector<16x8xf32>, vector<16x8xf32>, vector<16x16xf32> -> vector<16x16xf32>
    %cst_28 = arith.constant 0.353553385 : f32
    %76 = vector.broadcast %cst_28 : f32 to vector<16x16xf32>
    %77 = arith.mulf %75, %76 : vector<16x16xf32>
    %cst_29 = arith.constant dense<0xFF800000> : vector<16xf32>
    %78 = vector.multi_reduction <maximumf>, %77, %cst_29 [1] : vector<16x16xf32> to vector<16xf32>
    %79 = vector.shape_cast %78 : vector<16xf32> to vector<16x1xf32>
    %80 = vector.broadcast %79 : vector<16x1xf32> to vector<16x16xf32>
    %81 = arith.subf %77, %80 : vector<16x16xf32>
    %82 = math.exp %81 : vector<16x16xf32>
    %cst_30 = arith.constant dense<0.000000e+00> : vector<16xf32>
    %83 = vector.multi_reduction <add>, %82, %cst_30 [1] : vector<16x16xf32> to vector<16xf32>
    %84 = vector.shape_cast %83 : vector<16xf32> to vector<16x1xf32>
    %85 = vector.broadcast %84 : vector<16x1xf32> to vector<16x16xf32>
    %86 = arith.divf %82, %85 : vector<16x16xf32>
    %cst_31 = arith.constant dense<0.000000e+00> : vector<16x8xf32>
    %87 = tpu.matmul %86, %74, %cst_31 {dimension_numbers = #tpu.dot_dimension_numbers<[1], [0], [0], [1], [0, 0, 1, 1], [], []>} : vector<16x16xf32>, vector<16x8xf32>, vector<16x8xf32> -> vector<16x8xf32>
    %88 = vector.extract_strided_slice %3 {offsets = [0, 40], sizes = [16, 8], strides = [1, 1]} : vector<16x64xf32> to vector<16x8xf32>
    %89 = vector.extract_strided_slice %6 {offsets = [0, 40], sizes = [16, 8], strides = [1, 1]} : vector<16x64xf32> to vector<16x8xf32>
    %90 = vector.extract_strided_slice %7 {offsets = [0, 40], sizes = [16, 8], strides = [1, 1]} : vector<16x64xf32> to vector<16x8xf32>
    %cst_32 = arith.constant dense<0.000000e+00> : vector<16x16xf32>
    %91 = tpu.matmul %88, %89, %cst_32 {dimension_numbers = #tpu.dot_dimension_numbers<[1], [1], [0], [0], [0, 0, 1, 0], [], []>} : vector<16x8xf32>, vector<16x8xf32>, vector<16x16xf32> -> vector<16x16xf32>
    %cst_33 = arith.constant 0.353553385 : f32
    %92 = vector.broadcast %cst_33 : f32 to vector<16x16xf32>
    %93 = arith.mulf %91, %92 : vector<16x16xf32>
    %cst_34 = arith.constant dense<0xFF800000> : vector<16xf32>
    %94 = vector.multi_reduction <maximumf>, %93, %cst_34 [1] : vector<16x16xf32> to vector<16xf32>
    %95 = vector.shape_cast %94 : vector<16xf32> to vector<16x1xf32>
    %96 = vector.broadcast %95 : vector<16x1xf32> to vector<16x16xf32>
    %97 = arith.subf %93, %96 : vector<16x16xf32>
    %98 = math.exp %97 : vector<16x16xf32>
    %cst_35 = arith.constant dense<0.000000e+00> : vector<16xf32>
    %99 = vector.multi_reduction <add>, %98, %cst_35 [1] : vector<16x16xf32> to vector<16xf32>
    %100 = vector.shape_cast %99 : vector<16xf32> to vector<16x1xf32>
    %101 = vector.broadcast %100 : vector<16x1xf32> to vector<16x16xf32>
    %102 = arith.divf %98, %101 : vector<16x16xf32>
    %cst_36 = arith.constant dense<0.000000e+00> : vector<16x8xf32>
    %103 = tpu.matmul %102, %90, %cst_36 {dimension_numbers = #tpu.dot_dimension_numbers<[1], [0], [0], [1], [0, 0, 1, 1], [], []>} : vector<16x16xf32>, vector<16x8xf32>, vector<16x8xf32> -> vector<16x8xf32>
    %104 = vector.extract_strided_slice %3 {offsets = [0, 48], sizes = [16, 8], strides = [1, 1]} : vector<16x64xf32> to vector<16x8xf32>
    %105 = vector.extract_strided_slice %6 {offsets = [0, 48], sizes = [16, 8], strides = [1, 1]} : vector<16x64xf32> to vector<16x8xf32>
    %106 = vector.extract_strided_slice %7 {offsets = [0, 48], sizes = [16, 8], strides = [1, 1]} : vector<16x64xf32> to vector<16x8xf32>
    %cst_37 = arith.constant dense<0.000000e+00> : vector<16x16xf32>
    %107 = tpu.matmul %104, %105, %cst_37 {dimension_numbers = #tpu.dot_dimension_numbers<[1], [1], [0], [0], [0, 0, 1, 0], [], []>} : vector<16x8xf32>, vector<16x8xf32>, vector<16x16xf32> -> vector<16x16xf32>
    %cst_38 = arith.constant 0.353553385 : f32
    %108 = vector.broadcast %cst_38 : f32 to vector<16x16xf32>
    %109 = arith.mulf %107, %108 : vector<16x16xf32>
    %cst_39 = arith.constant dense<0xFF800000> : vector<16xf32>
    %110 = vector.multi_reduction <maximumf>, %109, %cst_39 [1] : vector<16x16xf32> to vector<16xf32>
    %111 = vector.shape_cast %110 : vector<16xf32> to vector<16x1xf32>
    %112 = vector.broadcast %111 : vector<16x1xf32> to vector<16x16xf32>
    %113 = arith.subf %109, %112 : vector<16x16xf32>
    %114 = math.exp %113 : vector<16x16xf32>
    %cst_40 = arith.constant dense<0.000000e+00> : vector<16xf32>
    %115 = vector.multi_reduction <add>, %114, %cst_40 [1] : vector<16x16xf32> to vector<16xf32>
    %116 = vector.shape_cast %115 : vector<16xf32> to vector<16x1xf32>
    %117 = vector.broadcast %116 : vector<16x1xf32> to vector<16x16xf32>
    %118 = arith.divf %114, %117 : vector<16x16xf32>
    %cst_41 = arith.constant dense<0.000000e+00> : vector<16x8xf32>
    %119 = tpu.matmul %118, %106, %cst_41 {dimension_numbers = #tpu.dot_dimension_numbers<[1], [0], [0], [1], [0, 0, 1, 1], [], []>} : vector<16x16xf32>, vector<16x8xf32>, vector<16x8xf32> -> vector<16x8xf32>
    %120 = vector.extract_strided_slice %3 {offsets = [0, 56], sizes = [16, 8], strides = [1, 1]} : vector<16x64xf32> to vector<16x8xf32>
    %121 = vector.extract_strided_slice %6 {offsets = [0, 56], sizes = [16, 8], strides = [1, 1]} : vector<16x64xf32> to vector<16x8xf32>
    %122 = vector.extract_strided_slice %7 {offsets = [0, 56], sizes = [16, 8], strides = [1, 1]} : vector<16x64xf32> to vector<16x8xf32>
    %cst_42 = arith.constant dense<0.000000e+00> : vector<16x16xf32>
    %123 = tpu.matmul %120, %121, %cst_42 {dimension_numbers = #tpu.dot_dimension_numbers<[1], [1], [0], [0], [0, 0, 1, 0], [], []>} : vector<16x8xf32>, vector<16x8xf32>, vector<16x16xf32> -> vector<16x16xf32>
    %cst_43 = arith.constant 0.353553385 : f32
    %124 = vector.broadcast %cst_43 : f32 to vector<16x16xf32>
    %125 = arith.mulf %123, %124 : vector<16x16xf32>
    %cst_44 = arith.constant dense<0xFF800000> : vector<16xf32>
    %126 = vector.multi_reduction <maximumf>, %125, %cst_44 [1] : vector<16x16xf32> to vector<16xf32>
    %127 = vector.shape_cast %126 : vector<16xf32> to vector<16x1xf32>
    %128 = vector.broadcast %127 : vector<16x1xf32> to vector<16x16xf32>
    %129 = arith.subf %125, %128 : vector<16x16xf32>
    %130 = math.exp %129 : vector<16x16xf32>
    %cst_45 = arith.constant dense<0.000000e+00> : vector<16xf32>
    %131 = vector.multi_reduction <add>, %130, %cst_45 [1] : vector<16x16xf32> to vector<16xf32>
    %132 = vector.shape_cast %131 : vector<16xf32> to vector<16x1xf32>
    %133 = vector.broadcast %132 : vector<16x1xf32> to vector<16x16xf32>
    %134 = arith.divf %130, %133 : vector<16x16xf32>
    %cst_46 = arith.constant dense<0.000000e+00> : vector<16x8xf32>
    %135 = tpu.matmul %134, %122, %cst_46 {dimension_numbers = #tpu.dot_dimension_numbers<[1], [0], [0], [1], [0, 0, 1, 1], [], []>} : vector<16x16xf32>, vector<16x8xf32>, vector<16x8xf32> -> vector<16x8xf32>
    %136 = tpu.concatenate %23, %39, %55, %71, %87, %103, %119, %135 in 1 : vector<16x8xf32>, vector<16x8xf32>, vector<16x8xf32>, vector<16x8xf32>, vector<16x8xf32>, vector<16x8xf32>, vector<16x8xf32>, vector<16x8xf32> -> vector<16x64xf32>
    %c0_47 = arith.constant 0 : index
    %c0_48 = arith.constant 0 : index
    %137 = vector.load %arg4[%c0_47, %c0_48] : memref<64x64xf32, #tpu.memory_space<vmem>>, vector<64x64xf32>
    %cst_49 = arith.constant dense<0.000000e+00> : vector<16x64xf32>
    %138 = tpu.matmul %136, %137, %cst_49 {dimension_numbers = #tpu.dot_dimension_numbers<[1], [0], [0], [1], [0, 0, 1, 1], [], []>} : vector<16x64xf32>, vector<64x64xf32>, vector<16x64xf32> -> vector<16x64xf32>
    %c0_50 = arith.constant 0 : index
    %c0_51 = arith.constant 0 : index
    %139 = vector.load %arg5[%c0_50, %c0_51] : memref<1x64xf32, #tpu.memory_space<vmem>>, vector<1x64xf32>
    %140 = vector.broadcast %139 : vector<1x64xf32> to vector<16x64xf32>
    %141 = arith.addf %138, %140 : vector<16x64xf32>
    %c0_52 = arith.constant 0 : index
    %c0_53 = arith.constant 0 : index
    %c0_54 = arith.constant 0 : index
    %142 = vector.load %arg6[%c0_52, %c0_53, %c0_54] : memref<1x16x64xf32, #tpu.memory_space<vmem>>, vector<1x16x64xf32>
    %143 = vector.shape_cast %142 : vector<1x16x64xf32> to vector<16x64xf32>
    %144 = vector.shape_cast %141 : vector<16x64xf32> to vector<1x16x64xf32>
    tpu.vector_store %arg6[%c0_52, %c0_53, %c0_54], %144 {strides = array<i32>} : memref<1x16x64xf32, #tpu.memory_space<vmem>>, vector<1x16x64xf32>,
    return
  }
  func.func @transform_0(%arg0: i32) -> (i32, i32, i32) {
    %c0_i32 = arith.constant 0 : i32
    %c0_i32_0 = arith.constant 0 : i32
    %c0_i32_1 = arith.constant 0 : i32
    return %arg0, %c0_i32, %c0_i32_0 : i32, i32, i32
  }
  func.func @transform_1(%arg0: i32) -> (i32, i32) {
    %c0_i32 = arith.constant 0 : i32
    %c0_i32_0 = arith.constant 0 : i32
    %c0_i32_1 = arith.constant 0 : i32
    return %c0_i32, %c0_i32_0 : i32, i32
  }
  func.func @transform_2(%arg0: i32) -> (i32, i32) {
    %c0_i32 = arith.constant 0 : i32
    %c0_i32_0 = arith.constant 0 : i32
    %c0_i32_1 = arith.constant 0 : i32
    return %c0_i32, %c0_i32_0 : i32, i32
  }
  func.func @transform_3(%arg0: i32) -> (i32, i32) {
    %c0_i32 = arith.constant 0 : i32
    %c0_i32_0 = arith.constant 0 : i32
    %c0_i32_1 = arith.constant 0 : i32
    return %c0_i32, %c0_i32_0 : i32, i32
  }
  func.func @transform_4(%arg0: i32) -> (i32, i32) {
    %c0_i32 = arith.constant 0 : i32
    %c0_i32_0 = arith.constant 0 : i32
    %c0_i32_1 = arith.constant 0 : i32
    return %c0_i32, %c0_i32_0 : i32, i32
  }
  func.func @transform_5(%arg0: i32) -> (i32, i32, i32) {
    %c0_i32 = arith.constant 0 : i32
    %c0_i32_0 = arith.constant 0 : i32
    %c0_i32_1 = arith.constant 0 : i32
    return %arg0, %c0_i32, %c0_i32_0 : i32, i32, i32
  }
}

</mosaic_0001>

<bundles_post_ra>
// kernel: tpu_custom_call.1
= control target key start
LH: loop header
LB: loop body
LE: loop exit
PB: predicated region body
PF: predicated region fallthrough
CT: control target
= control target key end

     0   :  { %10 = vsyncpa [#allocation3], 0  ;;  %s2750_s0 = inlined_call_operand.hbm [shape: f32[2,16,64], index: 0, kind: input, shape index: {}]   ;;  %s2751_s1 = inlined_call_operand.hbm [shape: f32[64,64], index: 1, kind: input, shape index: {}]   ;;  %s2752_s2 = inlined_call_operand.hbm [shape: f32[64,128], index: 2, kind: input, shape index: {}]   ;;  %s2753_s3 = inlined_call_operand.hbm [shape: f32[64,64], index: 3, kind: input, shape index: {}]   ;;  %s2754_s4 = inlined_call_operand.vmem [shape: f32[1,64], index: 4, kind: input, shape index: {}]   ;;  %s2755_s5 = inlined_call_operand.hbm [shape: f32[2,16,64], index: 5, kind: output, shape index: {}]  }
   0x1   :  { %12 = vsyncpa [#allocation3 + $0x1], 0 }
   0x2   :  { %13 = vsyncpa [#allocation6], 0 }
   0x3   :  { %14 = vsyncpa [#allocation9], 0 }
   0x4   :  { %15 = vsyncpa [#allocation4], 0 }
   0x5   :  { %17 = vsyncpa [#allocation4 + $0x1], 0  ;;  %s2117_s18 = smov 0   ;;  %s2119_s19 = smov 0  }
   0x6   :  { %s2121_s20 = smov 0   ;;  %s2123_s21 = smov 0  }
   0x7 LB: > { %s2138_s22 = sadd.s32 4294967295, %s2064_s21   ;;  %s1592_s23 = sadd.s32 4294967294, %s2064_s21   ;;  %s2064_s21 = sphi %s2123_s21, %s2774_s21   ;;  %s2060_s20 = sphi %s2121_s20, %s2773_s20   ;;  %s2056_s19 = sphi %s2119_s19, %s2772_s19   ;;  %s2052_s18 = sphi %s2117_s18, %s2771_s18  }
   0x8   : > { %p43_p0 = scmp.ne.s32.totalorder %s2056_s19, %s2052_s18  ;;  %p44_p1 = scmp.eq.s32.totalorder %s2138_s22, 0 }
   0x9   : > { %p151_p2 = scmp.eq.s32.totalorder %s2138_s22, 1  ;;  %p157_p3 = scmp.eq.s32.totalorder %s1592_s23, 1 }
   0xa   : > { %p2147_p4 = por %p44_p1, %p43_p0  ;;  %p1593_p5 = scmp.ge.s32.totalorder %s2064_s21, 1 }
   0xb   : > { %p2152_p6 = por %p157_p3, %p43_p0  ;;  %p164_p7 = scmp.lt.s32.totalorder %s2064_s21, 3 }
   0xc   : > { %s175_s28 = sshll.u32 %s2751_s1, 4  ;;  %s2066_s30 = smov [#allocation5]   ;;  %s176_s28 = int_to_ptr.hbm [resolvable:$true] %s175_s28 }
   0xd   : > { %p2160_p8 = pnand %p1593_p5, %p164_p7  ;;  %s177_s6 = sshll.u32 %s2066_s30, 4  ;;  %s178_s6 = int_to_ptr.vmem [resolvable:$true] %s177_s6 }
   0xe   : > { %s189_s10 = sshll.u32 %s2752_s2, 4  ;;  %s2756_s11 = smov 128   ;;  %s190_s10 = int_to_ptr.hbm [resolvable:$true] %s189_s10 }
   0xf   : > { %p1686_p9 = pneg %p2160_p8  ;;  %s2068_s12 = smov 8  }
  0x10   : > { %s2069_s13 = smov [#allocation7]   ;;  %s203_s17 = sshll.u32 %s2753_s3, 4  ;;  %s204_s17 = int_to_ptr.hbm [resolvable:$true] %s203_s17 }
  0x11   : > { %p2168_p10 = pnand %p1686_p9, %p44_p1  ;;  %s191_s14 = sshll.u32 %s2069_s13, 4  ;;  %s192_s14 = int_to_ptr.vmem [resolvable:$true] %s191_s14 }
  0x12   : > { %s2070_s23 = smov [#allocation8]   ;;  %s2190_s27 = sadd.s32 1, %s2064_s21  }
  0x13   : > { %1689 = dma.hbm_to_vmem [thread:$0]  (!%p2168_p10), %s176_s28, 1024, %s178_s6, [#allocation6], %s2756_s11, %s2756_s11, %s2068_s12  }
  0x14   : > { %1692 = dma.hbm_to_vmem [thread:$0]  (!%p2168_p10), %s190_s10, 1024, %s192_s14, [#allocation6], %s2756_s11, %s2756_s11, %s2068_s12  }
  0x15   : > { %s205_s26 = sshll.u32 %s2070_s23, 4  ;;  %s27_s28 = ssub.s32 %s2064_s21, %s2190_s27  ;;  %s206_s26 = int_to_ptr.vmem [resolvable:$true] %s205_s26 }
  0x16   : > { %1695 = dma.hbm_to_vmem [thread:$0]  (!%p2168_p10), %s204_s17, 1024, %s206_s26, [#allocation9], %s2756_s11, %s2756_s11, %s2068_s12  }
  0x17   : > { %s30_s30 = sadd.s32 1, %s2060_s20  ;;  %p28_p12 = scmp.eq.s32.totalorder %s27_s28, 0 }
  0x18   : > { %p37_p13 = scmp.ne.s32.totalorder %s2060_s20, %s2056_s19  ;;  %p38_p0 = scmp.eq.s32.totalorder %s2064_s21, 0 }
  0x19   : > { %s2204_s6 = scalar_select %p28_p12, %s2060_s20, %s30_s30  }
  0x1a   : > { %p2208_p3 = por %p151_p2, %p37_p13  ;;  %p1707_p5 = scmp.lt.s32.totalorder %s2064_s21, 2 }
  0x1b   : > { %s222_s9 = sand.u32 1, %s2060_s20   ;;  %s1666_s7 = sshll.u32 %s2064_s21, 4 }
  0x1c   : > { %p39_p7 = por %p38_p0, %p37_p13  ;;  %s1598_s10 = sshll.u32 %s222_s9, 4 }
  0x1d   : > { %s231_s15 = scalar_lea.hbm %s2750_s0, %s1666_s7  ;;  %s226_s17 = scalar_lea.vmem [#allocation2], %s1598_s10 }
  0x1e   : > { %s232_s16 = sshll.u32 %s231_s15, 4  ;;  %s234_s23 = sshll.u32 %s226_s17, 4  ;;  %s233_s16 = int_to_ptr.hbm [resolvable:$true] %s232_s16  ;;  %s235_s23 = int_to_ptr.vmem [resolvable:$true] %s234_s23 }
  0x1f   : > { %p2218_p9 = pnand %p1707_p5, %p39_p7  ;;  %s223_s28 = scalar_lea.sflag [#allocation3], %s222_s9 }
  0x20   : > { %s1960_s30 = sshra.s32 %s233_s16, 4  ;;  %s1967_s10 = scalar_lea.hbm %s2750_s0, 32  ;;  %s1961_s30 = int_to_ptr.hbm [resolvable:$true] %s1960_s30 }
  0x21   : > { %s1962_s11 = scalar_lea.hbm %s1961_s30, 16  ;;  %p1964_p10 = pneg %p2218_p9 }
  0x22   : > { %p1963_p2 = scmp.ne.s32.totalorder %s1961_s30, %s1962_s11  ;;  %p1968_p0 = scmp.lt.s32.totalorder %s1961_s30, %s2750_s0 }
  0x23   : > { %p1969_p5 = scmp.lt.s32.totalorder %s1967_s10, %s1962_s11 }
  0x24   : > { %p1965_p12 = pnand %p1964_p10, %p1963_p2 }
  0x25   : > { %p1970_p7 = por %p1969_p5, %p1968_p0 }
  0x26   : > { %p1966_p13 = pneg %p1965_p12 }
  0x28   : > { %p1971_p11 = pnand %p1970_p7, %p1966_p13 }
  0x2a   : > { %1974 = shalt.err (!%p1971_p11)
}
  0x2b   : > { %s2763_s9 = smov 128   ;;  %246 = sbr.rel (%p2160_p8) target bundleno = 1616 (0x650), region = 40 }
  0x2c   : > { %1699 = dma.hbm_to_vmem [thread:$0]  (!%p2218_p9), %s233_s16, 256, %s235_s23, %s223_s28, %s2763_s9, %s2763_s9, %s2068_s12  }
  0x2d   : > { %s2238_s17 = sand.u32 (!%p2160_p8), 1, %s2056_s19  }
  0x2e   : > { %s1602_s11 = sshll.u32 (!%p2160_p8), %s2238_s17, 4  ;;  %s249_s30 = scalar_lea.sflag (!%p2160_p8), [#allocation3], %s2238_s17 }
  0x2f   : > { %s2244_s7 = scalar_lea.vmem (!%p2160_p8), [#allocation2], %s1602_s11 }
  0x30   : > { %2035 = dma.done.wait (%p2147_p4), %s249_s30, 256  }
  0x31   : > { %2037 = vsyncadd (%p2147_p4), %s249_s30, 4294967040 }
  0x32   : > { %2039 = dma.done.wait (%p44_p1), [#allocation6], 2048  }
  0x33   : > { %2041 = vsyncadd (%p44_p1), [#allocation6], 4294965248 }
  0x34   : > { %2043 = dma.done.wait (%p44_p1), [#allocation9], 1024  }
  0x35   : > { %2045 = vsyncadd (%p44_p1), [#allocation9], 4294966272  ;;  %v304_v0 = vld [vmem:[#allocation5 + $0x38] sm:$0xff]  ;;  %v303_v2 = vld [vmem:[#allocation5 + $0x30] sm:$0xff]  ;;  %vm305_vm0 = vcmask 523264   ;;  %s2071_s24 = smov 120  }
  0x36   : > { %v342_v1 = vld [vmem:[#allocation7 + $0x38] sm:$0xff]  ;;  %320 = vmatpush.msra.mxu0 %v304_v0  ;;  %v341_v3 = vld [vmem:[#allocation7 + $0x30] sm:$0xff]  ;;  %v302_v4 = vld [vmem:[#allocation5 + $0x28] sm:$0xff]  ;;  %vm366_vm1 = vcmask 64512   ;;  %s2072_s29 = smov 112   ;;  %s2073_s12 = smov 64  }
  0x37   : > { %351 = vmatpush.msra.mxu1 %v342_v1  ;;  %v340_v5 = vld [vmem:[#allocation7 + $0x28] sm:$0xff]  ;;  %v301_v6 = vld [vmem:[#allocation5 + $0x20] sm:$0xff]  ;;  %v300_v8 = vld [vmem:[#allocation5 + $0x18] sm:$0xff]  ;;  %s2074_s16 = smov 104   ;;  %s2075_s23 = smov 88   ;;  %vm404_vm2 = vcmask 130048  }
  0x38   : > { %321 = vmatpush.msra.mxu0 %v303_v2  ;;  %v339_v7 = vld [vmem:[#allocation7 + $0x20] sm:$0xff]  ;;  %v338_v9 = vld [vmem:[#allocation7 + $0x18] sm:$0xff]  ;;  %v299_v10 = vld [vmem:[#allocation5 + $0x10] sm:$0xff]  ;;  %s2076_s26 = smov 96   ;;  %s2077_s28 = smov 72  }
  0x39   : > { %352 = vmatpush.msra.mxu1 %v341_v3  ;;  %v337_v11 = vld [vmem:[#allocation7 + $0x10] sm:$0xff]  ;;  %v298_v12 = vld [vmem:[#allocation5 + $0x8] sm:$0xff]  ;;  %v297_v14 = vld [vmem:[#allocation5] sm:$0xff]  ;;  %s2078_s13 = smov 80   ;;  %s2079_s10 = smov 56  }
  0x3a   : > { %322 = vmatpush.msra.mxu0 %v302_v4  ;;  %v336_v13 = vld [vmem:[#allocation7 + $0x8] sm:$0xff]  ;;  %v335_v15 = vld [vmem:[#allocation7] sm:$0xff]  ;;  %s2080_s14 = smov 48   ;;  %s2081_s15 = smov 40  }
  0x3b   : > { %353 = vmatpush.msra.mxu1 %v340_v5  ;;  %v295_v16 = vld [vmem:[%s2244_s7] sm:$0xff]  ;;  %v296_v17 = vld [vmem:[%s2244_s7 + $0x8] sm:$0xff]  ;;  %s2082_s9 = smov 32   ;;  %s2083_s30 = smov 24  }
  0x3c   : > { %323 = vmatpush.msra.mxu0 %v301_v6  ;;  %s2084_s7 = smov 16  }
  0x3d   : > { %354 = vmatpush.msra.mxu1 %v339_v7 }
  0x3e   : > { %324 = vmatpush.msra.mxu0 %v300_v8 }
  0x3f   : > { %355 = vmatpush.msra.mxu1 %v338_v9 }
  0x40   : > { %325 = vmatpush.msra.mxu0 %v299_v10 }
  0x41   : > { %356 = vmatpush.msra.mxu1 %v337_v11 }
  0x42   : > { %326 = vmatpush.msra.mxu0 %v298_v12 }
  0x43   : > { %357 = vmatpush.msra.mxu1 %v336_v13 }
  0x44   : > { %327 = vmatpush.msra.mxu0 %v297_v14 }
  0x45   : > { %358 = vmatpush.msra.mxu1 %v335_v15  ;;  %1607 = vmatmul.msk.f32.vlgmr.msra.gmra.mxu0 %vm305_vm0, %v295_v16 }
  0x46   : > { %1609 = vmatmul.msk.f32.vlgmr.msra.gmra.mxu1 %vm305_vm0, %v295_v16 }
  0x4d   : > { %1608 = vmatmul.msk.f32.gmra.mxu0 %vm305_vm0, %v296_v17 }
  0x4e   : > { %1610 = vmatmul.msk.f32.gmra.mxu1 %vm305_vm0, %v296_v17 }
  0xc2   : > { %v2264_v18 = vpop.f32.mrf.mxu0 }
  0xc3   : > { %v2266_v19 = vpop.f32.mrf.mxu1  ;;  %488 = vrot.lane.b32.xlu1 %v2264_v18, %s2071_s24 }
  0xca   : > { %v2287_v22 = vpop.f32.mrf.mxu0 }
  0xcb   : > { %v2270_v20 = vpop.f32.mrf.mxu1  ;;  %616 = vrot.lane.b32.xlu1 %v2266_v19, %s2072_s29 }
  0xcc   : > { %1611 = vmatpush.xpose.msk.msra.mxu2 %vm366_vm1, %v2270_v20  ;;  %v2278_v21 = vpack.i.bf16 %v2266_v19, %v2270_v20 }
  0xce   : > { %1766 = vrot.lane.b32.xlu2 %v2278_v21, %s2073_s12 }
  0xd0   : > { %1612 = vmatpush.xpose.msk.msra.mxu2 %vm366_vm1, %v2266_v19 }
  0xd3   : > { %1613 = vmatmul.msk.f32.vlgmr.msra.gmra.mxu2 %vm366_vm1, %v2264_v18 }
  0xd6   : > { %494 = vrot.lane.b32.xlu2 %v2270_v20, %s2071_s24 }
  0xdb   : > { %1614 = vmatmul.msk.f32.gmra.mxu2 %vm366_vm1, %v2287_v22 }
  0xde   : > { %490 = vrot.lane.b32.xlu2 %v2287_v22, %s2071_s24 }
  0xe6   : > { %742 = vrot.lane.b32.xlu2 %v2270_v20, %s2074_s16 }
  0xee   : > { %740 = vrot.lane.b32.xlu2 %v2266_v19, %s2074_s16 }
  0xf6   : > { %618 = vrot.lane.b32.xlu2 %v2270_v20, %s2072_s29 }
  0xfe   : > { %990 = vrot.lane.b32.xlu2 %v2270_v20, %s2075_s23 }
 0x106   : > { %984 = vrot.lane.b32.xlu2 %v2264_v18, %s2075_s23 }
 0x10e   : > { %864 = vrot.lane.b32.xlu2 %v2266_v19, %s2076_s26 }
 0x116   : > { %860 = vrot.lane.b32.xlu2 %v2264_v18, %s2076_s26 }
 0x11e   : > { %862 = vrot.lane.b32.xlu2 %v2287_v22, %s2076_s26 }
 0x126   : > { %1234 = vrot.lane.b32.xlu2 %v2287_v22, %s2077_s28 }
 0x128   : > { %v1767_v23 = vpop.permute.xlu2 %1766 }
 0x129   : > { %v1768_v24 = vunpack.i.l.bf16 %v1767_v23  ;;  %v1769_v25 = vunpack.i.h.bf16 %v1767_v23 }
 0x12b   : > { %479 = vmatpush.msra.mxu3 %v1768_v24 }
 0x12d   : > { %480 = vmatpush.msra.mxu3 %v1769_v25 }
 0x130   : > { %v495_v26 = vpop.permute.xlu2 %494 }
 0x131   : > { %1617 = vmatpush.xpose.msk.msrb.mxu3 %vm366_vm1, %v495_v26 }
 0x135   : > { %v2318_v30 = vpop.permute.xlu1 %488 }
 0x138   : > { %v2312_v27 = vpop.permute.xlu2 %490 }
 0x13d   : > { %v617_v32 = vpop.permute.xlu1 %616 }
 0x140   : > { %v2314_v28 = vpop.permute.xlu2 %742 }
 0x148   : > { %v2316_v29 = vpop.permute.xlu2 %740 }
 0x150   : > { %v619_v31 = vpop.permute.xlu2 %618 }
 0x151   : > { %1623 = vmatpush.xpose.msk.msrb.mxu0 %vm366_vm1, %v619_v31  ;;  %1668 = vmatpush.xpose.msk.msrb.mxu1 %vm366_vm1, %v619_v31 }
 0x155   : > { %1624 = vmatpush.xpose.msk.msrb.mxu0 %vm366_vm1, %v617_v32  ;;  %1669 = vmatpush.xpose.msk.msrb.mxu1 %vm366_vm1, %v617_v32 }
 0x156   : > { %v396_v33 = vpop.f32.mrf.mxu2 }
 0x157   : > { %v402_v34 = vmul.f32 0.35355338, %v396_v33 }
 0x158   : > { %v991_v51 = vpop.permute.xlu2 %990 }
 0x159   : > { %v405_v35 = vsel %vm404_vm2, %v402_v34, -inf }
 0x15a   : > { %406 = vmax.xlane.f32.xlu0 %v405_v35 }
 0x15e   : > { %v399_v36 = vpop.f32.mrf.mxu2 }
 0x15f   : > { %v403_v37 = vmul.f32 0.35355338, %v399_v36 }
 0x160   : > { %v2353_v54 = vpop.permute.xlu2 %984 }
 0x161   : > { %v408_v38 = vsel %vm404_vm2, %v403_v37, -inf }
 0x162   : > { %409 = vmax.xlane.f32.xlu0 %v408_v38 }
 0x168   : > { %v865_v56 = vpop.permute.xlu2 %864 }
 0x176   : > { %492 = vrot.lane.b32.xlu0 %v2266_v19, %s2071_s24  ;;  %s2085_s24 = smov 8  }
 0x17e   : > { %736 = vrot.lane.b32.xlu0 %v2264_v18, %s2074_s16 }
 0x186   : > { %738 = vrot.lane.b32.xlu0 %v2287_v22, %s2074_s16  ;;  %s294_s16 = scalar_lea.vmem [#allocation10], %s1602_s11 }
 0x18e   : > { %988 = vrot.lane.b32.xlu0 %v2266_v19, %s2075_s23 }
 0x196   : > { %866 = vrot.lane.b32.xlu0 %v2270_v20, %s2076_s26 }
 0x19e   : > { %1238 = vrot.lane.b32.xlu0 %v2270_v20, %s2077_s28 }
 0x1a6   : > { %1232 = vrot.lane.b32.xlu0 %v2264_v18, %s2077_s28 }
 0x1ae   : > { %1112 = vrot.lane.b32.xlu0 %v2266_v19, %s2078_s13 }
 0x1b6   : > { %1110 = vrot.lane.b32.xlu0 %v2287_v22, %s2078_s13 }
 0x1cd   : > { %v407_v39 = vpop.xlane.xlu0 %406 }
 0x1ce   : > { %v411_v40 = vsub.f32 %v402_v34, %v407_v39 }
 0x1d0   : > { %v413_v41 = vmul.f32 1.442695, %v411_v40 }
 0x1d2   : > { %1806 = vpow2.f32 %v413_v41 }
 0x1d5   : > { %v410_v42 = vpop.xlane.xlu0 %409 }
 0x1d6   : > { %v412_v43 = vsub.f32 %v403_v37, %v410_v42 }
 0x1d8   : > { %v1807_v44 = vpop.eup %1806  ;;  %v415_v45 = vmul.f32 1.442695, %v412_v43 }
 0x1d9   : > { %v417_v46 = vsel %vm404_vm2, %v1807_v44, 0.0 }
 0x1da   : > { %1808 = vpow2.f32 %v415_v45  ;;  %418 = vadd.xlane.f32.xlu1 %v417_v46 }
 0x1e0   : > { %v1809_v47 = vpop.eup %1808 }
 0x1e1   : > { %v420_v48 = vsel %vm404_vm2, %v1809_v47, 0.0 }
 0x1e2   : > { %421 = vadd.xlane.f32.xlu1 %v420_v48 }
 0x1e8   : > { %v493_v49 = vpop.permute.xlu0 %492 }
 0x1e9   : > { %1618 = vmatpush.xpose.msk.msrb.mxu3 %vm366_vm1, %v493_v49 }
 0x1f0   : > { %v2347_v50 = vpop.permute.xlu0 %736 }
 0x1f8   : > { %v2349_v52 = vpop.permute.xlu0 %738 }
 0x1fb   : > { %612 = vrot.lane.b32.xlu1 %v2264_v18, %s2072_s29 }
 0x200   : > { %v989_v53 = vpop.permute.xlu0 %988 }
 0x203   : > { %614 = vrot.lane.b32.xlu1 %v2287_v22, %s2072_s29 }
 0x208   : > { %v867_v55 = vpop.permute.xlu0 %866 }
 0x209   : > { %1635 = vmatpush.xpose.msk.msra.mxu0 %vm366_vm1, %v867_v55 }
 0x20b   : > { %986 = vrot.lane.b32.xlu1 %v2287_v22, %s2075_s23  ;;  %s1667_s23 = sshll.u32 %s2138_s22, 4 }
 0x20d   : > { %1636 = vmatpush.xpose.msk.msra.mxu0 %vm366_vm1, %v865_v56 }
 0x213   : > { %1236 = vrot.lane.b32.xlu1 %v2266_v19, %s2077_s28 }
 0x21b   : > { %1114 = vrot.lane.b32.xlu1 %v2270_v20, %s2078_s13  ;;  %v1239_v20 = vpop.permute.xlu0 %1238 }
 0x223   : > { %1108 = vrot.lane.b32.xlu1 %v2264_v18, %s2078_s13  ;;  %v861_v18 = vpop.permute.xlu2 %860  ;;  %v1233_v25 = vpop.permute.xlu0 %1232  ;;  %s1486_s13 = scalar_lea.hbm %s2755_s5, %s1667_s23 }
 0x22b   : > { %v863_v23 = vpop.permute.xlu2 %862 }
 0x24d   : > { %v419_v57 = vpop.xlane.xlu1 %418 }
 0x24e   : > { %1810 = vrcp.f32 %v419_v57  ;;  %v434_v62 = vand.u32 2147483648, %v419_v57  ;;  %v432_v0 = vand.u32 2147483647, %v419_v57  ;;  %vm428_vm4 = vweird.f32 %v419_v57 }
 0x250   : > { %v435_v3 = vor.u32 1.1754944e-38, %v434_v62  ;;  %vm433_vm6 = vcmp.eq.f32.partialorder %v432_v0, 8.507059e+37 }
 0x254   : > { %v1811_v58 = vpop.eup %1810 }
 0x255   : > { %v424_v59 = vmul.f32 %v1811_v58, %v419_v57  ;;  %v422_v60 = vpop.xlane.xlu1 %421  ;;  %vm429_vm3 = vweird.f32 %v1811_v58 }
 0x256   : > { %1812 = vrcp.f32 %v422_v60  ;;  %vm430_vm5 = vmor %vm428_vm4, %vm429_vm3  ;;  %v449_v9 = vand.u32 2147483648, %v422_v60  ;;  %v447_v11 = vand.u32 2147483647, %v422_v60  ;;  %vm443_vm8 = vweird.f32 %v422_v60 }
 0x257   : > { %v425_v61 = vsub.f32 1.0, %v424_v59 }
 0x258   : > { %v450_v13 = vor.u32 1.1754944e-38, %v449_v9  ;;  %vm448_vm10 = vcmp.eq.f32.partialorder %v447_v11, 8.507059e+37 }
 0x259   : > { %v426_v63 = vmul.f32 %v1811_v58, %v425_v61 }
 0x25b   : > { %v427_v1 = vadd.f32 %v1811_v58, %v426_v63 }
 0x25c   : > { %v1813_v2 = vpop.eup %1812 }
 0x25d   : > { %v439_v4 = vmul.f32 %v1813_v2, %v422_v60  ;;  %v431_v5 = vsel %vm430_vm5, %v1811_v58, %v427_v1  ;;  %vm444_vm7 = vweird.f32 %v1813_v2 }
 0x25e   : > { %v436_v6 = vsel %vm433_vm6, %v435_v3, %v431_v5  ;;  %vm445_vm9 = vmor %vm443_vm8, %vm444_vm7 }
 0x25f   : > { %v440_v7 = vsub.f32 1.0, %v439_v4  ;;  %v437_v8 = vmul.f32 %v1807_v44, %v436_v6 }
 0x261   : > { %v441_v10 = vmul.f32 %v1813_v2, %v440_v7  ;;  %1615 = vmatmul.msk.f32.vlgmr.msra.gmra.mxu3 %vm404_vm2, %v437_v8 }
 0x262   : > { %1629 = vmatpush.xpose.msk.msra.mxu3 %vm366_vm1, %v2314_v28 }
 0x263   : > { %v442_v12 = vadd.f32 %v1813_v2, %v441_v10 }
 0x265   : > { %v446_v14 = vsel %vm445_vm9, %v1813_v2, %v442_v12 }
 0x266   : > { %1630 = vmatpush.xpose.msk.msra.mxu3 %vm366_vm1, %v2316_v29  ;;  %v451_v15 = vsel %vm448_vm10, %v450_v13, %v446_v14 }
 0x267   : > { %v452_v16 = vmul.f32 %v1809_v47, %v451_v15 }
 0x269   : > { %1616 = vmatmul.msk.f32.gmra.mxu3 %vm404_vm2, %v452_v16 }
 0x26d   : > { %v613_v17 = vpop.permute.xlu1 %612 }
 0x26e   : > { %1625 = vmatmul.msk.f32.vlgmr.msrb.gmra.mxu0 %vm366_vm1, %v613_v17 }
 0x271   : > { %1619 = vmatmul.msk.f32.vlgmr.msrb.gmra.mxu3 %vm366_vm1, %v2318_v30  ;;  %v1235_v30 = vpop.permute.xlu2 %1234 }
 0x272   : > { %1641 = vmatpush.xpose.msk.msrb.mxu3 %vm366_vm1, %v991_v51 }
 0x275   : > { %v615_v19 = vpop.permute.xlu1 %614 }
 0x276   : > { %1642 = vmatpush.xpose.msk.msrb.mxu3 %vm366_vm1, %v989_v53  ;;  %1626 = vmatmul.msk.f32.vlgmr.msrb.gmra.mxu1 %vm366_vm1, %v615_v19 }
 0x277   : > { %1637 = vmatmul.msk.f32.vlgmr.msra.gmra.mxu0 %vm366_vm1, %v861_v18 }
 0x279   : > { %1620 = vmatmul.msk.f32.gmra.mxu3 %vm366_vm1, %v2312_v27  ;;  %v1113_v27 = vpop.permute.xlu0 %1112 }
 0x27d   : > { %v987_v22 = vpop.permute.xlu1 %986 }
 0x27f   : > { %1638 = vmatmul.msk.f32.gmra.mxu0 %vm366_vm1, %v863_v23 }
 0x281   : > { %1631 = vmatmul.msk.f32.vlgmr.msra.gmra.mxu3 %vm366_vm1, %v2347_v50  ;;  %v1111_v29 = vpop.permute.xlu0 %1110 }
 0x282   : > { %1653 = vmatpush.xpose.msk.msra.mxu3 %vm366_vm1, %v1239_v20 }
 0x285   : > { %v1237_v24 = vpop.permute.xlu1 %1236 }
 0x286   : > { %1654 = vmatpush.xpose.msk.msra.mxu3 %vm366_vm1, %v1237_v24 }
 0x289   : > { %1632 = vmatmul.msk.f32.gmra.mxu3 %vm366_vm1, %v2349_v52 }
 0x28d   : > { %v1115_v26 = vpop.permute.xlu1 %1114 }
 0x28e   : > { %1647 = vmatpush.xpose.msk.msrb.mxu0 %vm366_vm1, %v1115_v26 }
 0x291   : > { %1643 = vmatmul.msk.f32.vlgmr.msrb.gmra.mxu3 %vm366_vm1, %v2353_v54 }
 0x292   : > { %1648 = vmatpush.xpose.msk.msrb.mxu0 %vm366_vm1, %v1113_v27 }
 0x295   : > { %v1109_v28 = vpop.permute.xlu1 %1108 }
 0x296   : > { %1649 = vmatmul.msk.f32.vlgmr.msrb.gmra.mxu0 %vm366_vm1, %v1109_v28 }
 0x299   : > { %1644 = vmatmul.msk.f32.gmra.mxu3 %vm366_vm1, %v987_v22 }
 0x29e   : > { %1650 = vmatmul.msk.f32.gmra.mxu0 %vm366_vm1, %v1111_v29 }
 0x2a1   : > { %1655 = vmatmul.msk.f32.vlgmr.msra.gmra.mxu3 %vm366_vm1, %v1233_v25 }
 0x2a9   : > { %1656 = vmatmul.msk.f32.gmra.mxu3 %vm366_vm1, %v1235_v30 }
 0x2e4   : > { %v2398_v31 = vpop.f32.mrf.mxu3 }
 0x2eb   : > { %v645_v32 = vpop.f32.mrf.mxu0 }
 0x2ec   : > { %v651_v33 = vmul.f32 0.35355338, %v645_v32  ;;  %v2400_v34 = vpop.f32.mrf.mxu3 }
 0x2ee   : > { %v653_v35 = vsel %vm404_vm2, %v651_v33, -inf }
 0x2ef   : > { %654 = vmax.xlane.f32.xlu2 %v653_v35 }
 0x2f3   : > { %v648_v36 = vpop.f32.mrf.mxu1 }
 0x2f4   : > { %v652_v37 = vmul.f32 0.35355338, %v648_v36  ;;  %v893_v38 = vpop.f32.mrf.mxu0  ;;  %v521_v39 = vpop.f32.mrf.mxu3 }
 0x2f5   : > { %v899_v40 = vmul.f32 0.35355338, %v893_v38  ;;  %v2442_v17 = vmul.f32 0.35355338, %v521_v39 }
 0x2f6   : > { %v656_v41 = vsel %vm404_vm2, %v652_v37, -inf }
 0x2f7   : > { %657 = vmax.xlane.f32.xlu0 %v656_v41  ;;  %v901_v42 = vsel %vm404_vm2, %v899_v40, -inf  ;;  %v529_v23 = vsel %vm404_vm2, %v2442_v17, -inf }
 0x2f8   : > { %902 = vmax.xlane.f32.xlu1 %v901_v42 }
 0x2fc   : > { %v896_v43 = vpop.f32.mrf.mxu0  ;;  %v524_v44 = vpop.f32.mrf.mxu3 }
 0x2fd   : > { %v900_v45 = vmul.f32 0.35355338, %v896_v43  ;;  %v2405_v46 = vmul.f32 0.35355338, %v524_v44 }
 0x2ff   : > { %v904_v47 = vsel %vm404_vm2, %v900_v45, -inf  ;;  %v532_v48 = vsel %vm404_vm2, %v2405_v46, -inf }
 0x300   : > { %905 = vmax.xlane.f32.xlu2 %v904_v47  ;;  %533 = vmax.xlane.f32.xlu1 %v532_v48 }
 0x304   : > { %v769_v49 = vpop.f32.mrf.mxu3 }
 0x305   : > { %v2426_v59 = vmul.f32 0.35355338, %v769_v49 }
 0x307   : > { %v777_v60 = vsel %vm404_vm2, %v2426_v59, -inf }
 0x30b   : > { %1771 = vrot.lane.b32.xlu0 %v2278_v21, %s2079_s10 }
 0x30c   : > { %v772_v50 = vpop.f32.mrf.mxu3 }
 0x30d   : > { %v2412_v51 = vmul.f32 0.35355338, %v772_v50 }
 0x30f   : > { %v780_v52 = vsel %vm404_vm2, %v2412_v51, -inf }
 0x310   : > { %781 = vmax.xlane.f32.xlu1 %v780_v52 }
 0x313   : > { %v1141_v53 = vpop.f32.mrf.mxu0 }
 0x314   : > { %v2416_v54 = vmul.f32 0.35355338, %v1141_v53  ;;  %v1017_v0 = vpop.f32.mrf.mxu3 }
 0x315   : > { %v2454_v28 = vmul.f32 0.35355338, %v1017_v0 }
 0x316   : > { %v1149_v55 = vsel %vm404_vm2, %v2416_v54, -inf }
 0x317   : > { %1150 = vmax.xlane.f32.xlu2 %v1149_v55  ;;  %v1025_v30 = vsel %vm404_vm2, %v2454_v28, -inf }
 0x31b   : > { %v1144_v56 = vpop.f32.mrf.mxu0 }
 0x31c   : > { %v2420_v57 = vmul.f32 0.35355338, %v1144_v56  ;;  %v1020_v10 = vpop.f32.mrf.mxu3 }
 0x31d   : > { %v2444_v18 = vmul.f32 0.35355338, %v1020_v10 }
 0x31e   : > { %v1152_v58 = vsel %vm404_vm2, %v2420_v57, -inf }
 0x31f   : > { %1153 = vmax.xlane.f32.xlu2 %v1152_v58  ;;  %v1028_v25 = vsel %vm404_vm2, %v2444_v18, -inf }
 0x324   : > { %v1265_v22 = vpop.f32.mrf.mxu3 }
 0x325   : > { %v2456_v29 = vmul.f32 0.35355338, %v1265_v22 }
 0x327   : > { %v1273_v32 = vsel %vm404_vm2, %v2456_v29, -inf }
 0x329   : > { %1781 = vrot.lane.b32.xlu1 %v2278_v21, %s2080_s14 }
 0x335   : > { %778 = vmax.xlane.f32.xlu0 %v777_v60 }
 0x362   : > { %v655_v61 = vpop.xlane.xlu2 %654 }
 0x363   : > { %v659_v62 = vsub.f32 %v651_v33, %v655_v61  ;;  %v1268_v33 = vpop.f32.mrf.mxu3 }
 0x364   : > { %v2462_v35 = vmul.f32 0.35355338, %v1268_v33 }
 0x365   : > { %v661_v63 = vmul.f32 1.442695, %v659_v62 }
 0x367   : > { %1814 = vpow2.f32 %v661_v63 }
 0x36a   : > { %v658_v1 = vpop.xlane.xlu0 %657 }
 0x36b   : > { %v903_v2 = vpop.xlane.xlu1 %902  ;;  %v660_v3 = vsub.f32 %v652_v37, %v658_v1  ;;  %v1276_v37 = vsel %vm404_vm2, %v2462_v35, -inf }
 0x36c   : > { %v907_v4 = vsub.f32 %v899_v40, %v903_v2 }
 0x36d   : > { %v2430_v5 = vpop.eup %1814  ;;  %v663_v6 = vmul.f32 1.442695, %v660_v3 }
 0x36e   : > { %v909_v7 = vmul.f32 1.442695, %v907_v4  ;;  %v665_v8 = vsel %vm404_vm2, %v2430_v5, 0.0 }
 0x36f   : > { %1816 = vpow2.f32 %v663_v6  ;;  %666 = vadd.xlane.f32.xlu2 %v665_v8 }
 0x370   : > { %1818 = vpow2.f32 %v909_v7 }
 0x373   : > { %v906_v9 = vpop.xlane.xlu2 %905  ;;  %v2464_v36 = vpop.xlane.xlu1 %533 }
 0x374   : > { %v908_v11 = vsub.f32 %v900_v45, %v906_v9 }
 0x375   : > { %v2434_v12 = vpop.eup %1816 }
 0x376   : > { %v2436_v13 = vpop.eup %1818  ;;  %v911_v14 = vmul.f32 1.442695, %v908_v11  ;;  %v668_v15 = vsel %vm404_vm2, %v2434_v12, 0.0 }
 0x377   : > { %v913_v16 = vsel %vm404_vm2, %v2436_v13, 0.0  ;;  %669 = vadd.xlane.f32.xlu2 %v668_v15 }
 0x378   : > { %1820 = vpow2.f32 %v911_v14  ;;  %914 = vadd.xlane.f32.xlu0 %v913_v16  ;;  %v536_v16 = vsub.f32 %v2405_v46, %v2464_v36 }
 0x37a   : > { %v539_v33 = vmul.f32 1.442695, %v536_v16 }
 0x37d   : > { %v1772_v19 = vpop.permute.xlu0 %1771 }
 0x37e   : > { %v2446_v20 = vpop.eup %1820  ;;  %v1773_v24 = vunpack.i.l.bf16 %v1772_v19  ;;  %v1774_v27 = vunpack.i.h.bf16 %v1772_v19 }
 0x37f   : > { %v916_v26 = vsel %vm404_vm2, %v2446_v20, 0.0  ;;  %530 = vmax.xlane.f32.xlu2 %v529_v23 }
 0x380   : > { %1029 = vmax.xlane.f32.xlu0 %v1028_v25  ;;  %917 = vadd.xlane.f32.xlu1 %v916_v26 }
 0x381   : > { %603 = vmatpush.msrb.mxu2 %v1773_v24 }
 0x383   : > { %604 = vmatpush.msrb.mxu2 %v1774_v27  ;;  %v782_v38 = vpop.xlane.xlu1 %781 }
 0x384   : > { %v784_v52 = vsub.f32 %v2412_v51, %v782_v38 }
 0x386   : > { %v787_v53 = vmul.f32 1.442695, %v784_v52 }
 0x387   : > { %1026 = vmax.xlane.f32.xlu2 %v1025_v30 }
 0x388   : > { %1274 = vmax.xlane.f32.xlu1 %v1273_v32 }
 0x38a   : > { %v1151_v42 = vpop.xlane.xlu2 %1150 }
 0x38b   : > { %v1155_v43 = vsub.f32 %v2416_v54, %v1151_v42 }
 0x38d   : > { %v1157_v44 = vmul.f32 1.442695, %v1155_v43 }
 0x38f   : > { %1822 = vpow2.f32 %v1157_v44 }
 0x390   : > { %1277 = vmax.xlane.f32.xlu1 %v1276_v37 }
 0x392   : > { %v1154_v58 = vpop.xlane.xlu2 %1153 }
 0x393   : > { %v1156_v26 = vsub.f32 %v2420_v57, %v1154_v58 }
 0x395   : > { %v2474_v48 = vpop.eup %1822  ;;  %v1159_v36 = vmul.f32 1.442695, %v1156_v26 }
 0x396   : > { %v1161_v50 = vsel %vm404_vm2, %v2474_v48, 0.0 }
 0x39b   : > { %v1782_v39 = vpop.permute.xlu1 %1781 }
 0x39c   : > { %v1783_v40 = vunpack.i.l.bf16 %v1782_v39  ;;  %v1784_v41 = vunpack.i.h.bf16 %v1782_v39 }
 0x39e   : > { %727 = vmatpush.msra.mxu1 %v1783_v40 }
 0x39f   : > { %1776 = vrot.lane.b32.xlu2 %v2278_v21, %s2081_s15 }
 0x3a0   : > { %728 = vmatpush.msra.mxu1 %v1784_v41 }
 0x3a8   : > { %v779_v45 = vpop.xlane.xlu0 %778 }
 0x3a9   : > { %1791 = vrot.lane.b32.xlu1 %v2278_v21, %s2082_s9  ;;  %v783_v47 = vsub.f32 %v2426_v59, %v779_v45 }
 0x3ab   : > { %v785_v49 = vmul.f32 1.442695, %v783_v47 }
 0x3ad   : > { %1824 = vpow2.f32 %v785_v49 }
 0x3ae   : > { %1826 = vpow2.f32 %v787_v53 }
 0x3b3   : > { %v2479_v55 = vpop.eup %1824 }
 0x3b4   : > { %v789_v54 = vsel %vm404_vm2, %v2479_v55, 0.0  ;;  %v2483_v56 = vpop.eup %1826 }
 0x3b5   : > { %v792_v59 = vsel %vm404_vm2, %v2483_v56, 0.0 }
 0x3c8   : > { %1162 = vadd.xlane.f32.xlu2 %v1161_v50 }
 0x3d3   : > { %790 = vadd.xlane.f32.xlu1 %v789_v54 }
 0x3db   : > { %793 = vadd.xlane.f32.xlu1 %v792_v59 }
 0x3e2   : > { %v667_v60 = vpop.xlane.xlu2 %666 }
 0x3e3   : > { %1828 = vrcp.f32 %v667_v60  ;;  %v682_v1 = vand.u32 2147483648, %v667_v60  ;;  %v680_v3 = vand.u32 2147483647, %v667_v60  ;;  %vm676_vm12 = vweird.f32 %v667_v60 }
 0x3e5   : > { %v683_v7 = vor.u32 1.1754944e-38, %v682_v1  ;;  %vm681_vm14 = vcmp.eq.f32.partialorder %v680_v3, 8.507059e+37 }
 0x3e9   : > { %v1829_v61 = vpop.eup %1828 }
 0x3ea   : > { %v672_v51 = vmul.f32 %v1829_v61, %v667_v60  ;;  %v670_v62 = vpop.xlane.xlu2 %669  ;;  %vm677_vm11 = vweird.f32 %v1829_v61 }
 0x3eb   : > { %1830 = vrcp.f32 %v670_v62  ;;  %v2487_v63 = vpop.xlane.xlu0 %914  ;;  %vm678_vm13 = vmor %vm676_vm12, %vm677_vm11  ;;  %v697_v22 = vand.u32 2147483648, %v670_v62  ;;  %v695_v30 = vand.u32 2147483647, %v670_v62  ;;  %vm691_vm3 = vweird.f32 %v670_v62 }
 0x3ec   : > { %v673_v0 = vsub.f32 1.0, %v672_v51  ;;  %vm924_vm7 = vweird.f32 %v2487_v63 }
 0x3ed   : > { %v698_v46 = vor.u32 1.1754944e-38, %v697_v22  ;;  %vm696_vm5 = vcmp.eq.f32.partialorder %v695_v30, 8.507059e+37 }
 0x3ee   : > { %v674_v2 = vmul.f32 %v1829_v61, %v673_v0 }
 0x3f0   : > { %v675_v4 = vadd.f32 %v1829_v61, %v674_v2 }
 0x3f1   : > { %v1831_v6 = vpop.eup %1830 }
 0x3f2   : > { %v679_v8 = vsel %vm678_vm13, %v1829_v61, %v675_v4  ;;  %v687_v9 = vmul.f32 %v1831_v6, %v670_v62  ;;  %v531_v10 = vpop.xlane.xlu2 %530  ;;  %vm692_vm15 = vweird.f32 %v1831_v6  ;;  %v930_v4 = vand.u32 2147483648, %v2487_v63 }
 0x3f3   : > { %v684_v11 = vsel %vm681_vm14, %v683_v7, %v679_v8  ;;  %v535_v14 = vsub.f32 %v2442_v17, %v531_v10  ;;  %v1030_v15 = vpop.xlane.xlu0 %1029  ;;  %vm693_vm4 = vmor %vm691_vm3, %vm692_vm15  ;;  %v2504_v43 = vpop.xlane.xlu1 %917 }
 0x3f4   : > { %v688_v19 = vsub.f32 1.0, %v687_v9  ;;  %v1032_v24 = vsub.f32 %v2444_v18, %v1030_v15  ;;  %v685_v25 = vmul.f32 %v2430_v5, %v684_v11  ;;  %v931_v9 = vor.u32 1.1754944e-38, %v930_v4 }
 0x3f5   : > { %v537_v23 = vmul.f32 1.442695, %v535_v14  ;;  %v945_v16 = vand.u32 2147483648, %v2504_v43  ;;  %vm939_vm11 = vweird.f32 %v2504_v43  ;;  %v943_v22 = vand.u32 2147483647, %v2504_v43 }
 0x3f6   : > { %v689_v27 = vmul.f32 %v1831_v6, %v688_v19  ;;  %v1035_v32 = vmul.f32 1.442695, %v1032_v24  ;;  %1627 = vmatmul.msk.f32.vlgmr.msra.gmra.mxu1 %vm404_vm2, %v685_v25 }
 0x3f7   : > { %1832 = vpow2.f32 %v537_v23  ;;  %v946_v24 = vor.u32 1.1754944e-38, %v945_v16  ;;  %vm944_vm13 = vcmp.eq.f32.partialorder %v943_v22, 8.507059e+37 }
 0x3f8   : > { %v690_v17 = vadd.f32 %v1831_v6, %v689_v27  ;;  %1834 = vpow2.f32 %v1035_v32 }
 0x3f9   : > { %1836 = vpow2.f32 %v539_v33 }
 0x3fa   : > { %v1027_v37 = vpop.xlane.xlu2 %1026  ;;  %v694_v18 = vsel %vm693_vm4, %v1831_v6, %v690_v17  ;;  %1838 = vpow2.f32 %v1159_v36  ;;  %v928_v6 = vand.u32 2147483647, %v2487_v63 }
 0x3fb   : > { %v1031_v5 = vsub.f32 %v2454_v28, %v1027_v37  ;;  %v699_v57 = vsel %vm696_vm5, %v698_v46, %v694_v18  ;;  %v1275_v60 = vpop.xlane.xlu1 %1274 }
 0x3fc   : > { %v700_v38 = vmul.f32 %v2434_v12, %v699_v57  ;;  %vm929_vm9 = vcmp.eq.f32.partialorder %v928_v6, 8.507059e+37  ;;  %v1279_v26 = vsub.f32 %v2456_v29, %v1275_v60 }
 0x3fd   : > { %v2498_v39 = vpop.eup %1832  ;;  %v1033_v40 = vmul.f32 1.442695, %v1031_v5 }
 0x3fe   : > { %v541_v41 = vsel %vm404_vm2, %v2498_v39, 0.0  ;;  %v2502_v42 = vpop.eup %1834  ;;  %1628 = vmatmul.msk.f32.gmra.mxu1 %vm404_vm2, %v700_v38  ;;  %v1281_v27 = vmul.f32 1.442695, %v1279_v26 }
 0x3ff   : > { %1840 = vpow2.f32 %v1033_v40  ;;  %542 = vadd.xlane.f32.xlu0 %v541_v41  ;;  %v1040_v12 = vsel %vm404_vm2, %v2502_v42, 0.0  ;;  %v2510_v44 = vpop.eup %1836 }
 0x400   : > { %1842 = vrcp.f32 %v2487_v63  ;;  %1041 = vadd.xlane.f32.xlu2 %v1040_v12  ;;  %v2512_v47 = vpop.eup %1838  ;;  %v544_v53 = vsel %vm404_vm2, %v2510_v44, 0.0 }
 0x401   : > { %1844 = vrcp.f32 %v2504_v43  ;;  %v1164_v58 = vsel %vm404_vm2, %v2512_v47, 0.0 }
 0x402   : > { %v1777_v28 = vpop.permute.xlu2 %1776  ;;  %1846 = vpow2.f32 %v1281_v27 }
 0x403   : > { %v1778_v45 = vunpack.i.l.bf16 %v1777_v28  ;;  %v1779_v52 = vunpack.i.h.bf16 %v1777_v28  ;;  %v1278_v1 = vpop.xlane.xlu1 %1277 }
 0x404   : > { %v1280_v30 = vsub.f32 %v2462_v35, %v1278_v1 }
 0x405   : > { %v2514_v49 = vpop.eup %1840  ;;  %851 = vmatpush.msra.mxu2 %v1778_v45 }
 0x406   : > { %v1843_v50 = vpop.eup %1842  ;;  %v1037_v54 = vsel %vm404_vm2, %v2514_v49, 0.0  ;;  %v1283_v32 = vmul.f32 1.442695, %v1280_v30 }
 0x407   : > { %545 = vadd.xlane.f32.xlu0 %v544_v53  ;;  %1038 = vadd.xlane.f32.xlu1 %v1037_v54  ;;  %v920_v59 = vmul.f32 %v1843_v50, %v2487_v63  ;;  %v1845_v51 = vpop.eup %1844  ;;  %vm925_vm6 = vweird.f32 %v1843_v50 }
 0x408   : > { %852 = vmatpush.msra.mxu2 %v1779_v52  ;;  %1165 = vadd.xlane.f32.xlu2 %v1164_v58  ;;  %v935_v0 = vmul.f32 %v1845_v51, %v2504_v43  ;;  %vm926_vm8 = vmor %vm924_vm7, %vm925_vm6  ;;  %vm940_vm10 = vweird.f32 %v1845_v51  ;;  %v2543_v17 = vpop.eup %1846  ;;  %1848 = vpow2.f32 %v1283_v32 }
 0x409   : > { %v921_v61 = vsub.f32 1.0, %v920_v59  ;;  %vm941_vm12 = vmor %vm939_vm11, %vm940_vm10 }
 0x40a   : > { %v936_v3 = vsub.f32 1.0, %v935_v0 }
 0x40b   : > { %v922_v62 = vmul.f32 %v1843_v50, %v921_v61 }
 0x40c   : > { %v937_v8 = vmul.f32 %v1845_v51, %v936_v3 }
 0x40d   : > { %v923_v2 = vadd.f32 %v1843_v50, %v922_v62 }
 0x40e   : > { %v938_v15 = vadd.f32 %v1845_v51, %v937_v8  ;;  %v2547_v33 = vpop.eup %1848 }
 0x40f   : > { %v927_v7 = vsel %vm926_vm8, %v1843_v50, %v923_v2 }
 0x410   : > { %v932_v11 = vsel %vm929_vm9, %v931_v9, %v927_v7  ;;  %v942_v23 = vsel %vm941_vm12, %v1845_v51, %v938_v15 }
 0x411   : > { %v933_v63 = vmul.f32 %v2436_v13, %v932_v11  ;;  %v947_v25 = vsel %vm944_vm13, %v946_v24, %v942_v23 }
 0x412   : > { %v948_v13 = vmul.f32 %v2446_v20, %v947_v25  ;;  %v1288_v20 = vsel %vm404_vm2, %v2547_v33, 0.0 }
 0x41b   : > { %v1792_v10 = vpop.permute.xlu1 %1791  ;;  %1786 = vrot.lane.b32.xlu0 %v2278_v21, %s2083_s30 }
 0x41c   : > { %v1793_v14 = vunpack.i.l.bf16 %v1792_v10  ;;  %v1794_v19 = vunpack.i.h.bf16 %v1792_v10 }
 0x41e   : > { %975 = vmatpush.msrb.mxu1 %v1793_v14 }
 0x420   : > { %976 = vmatpush.msrb.mxu1 %v1794_v19  ;;  %1801 = vrot.lane.b32.xlu1 %v2278_v21, %s2084_s7 }
 0x421   : > { %1796 = vrot.lane.b32.xlu2 %v2278_v21, %s2085_s24  ;;  %1639 = vmatmul.msk.f32.vlgmr.msrb.gmra.mxu1 %vm404_vm2, %v933_v63  ;;  %v1285_v21 = vsel %vm404_vm2, %v2543_v17, 0.0 }
 0x429   : > { %1640 = vmatmul.msk.f32.gmra.mxu1 %vm404_vm2, %v948_v13 }
 0x43b   : > { %v2551_v46 = vpop.xlane.xlu2 %1162 }
 0x43c   : > { %1850 = vrcp.f32 %v2551_v46  ;;  %vm1172_vm6 = vweird.f32 %v2551_v46  ;;  %v1178_v13 = vand.u32 2147483648, %v2551_v46 }
 0x442   : > { %v2560_v18 = vpop.eup %1850 }
 0x443   : > { %v1168_v45 = vmul.f32 %v2560_v18, %v2551_v46  ;;  %vm1173_vm8 = vweird.f32 %v2560_v18 }
 0x444   : > { %vm2601_vm12 = vmor %vm1172_vm6, %vm1173_vm8 }
 0x445   : > { %1286 = vadd.xlane.f32.xlu0 %v1285_v21  ;;  %v1169_v61 = vsub.f32 1.0, %v1168_v45  ;;  %v1176_v21 = vand.u32 2147483647, %v2551_v46 }
 0x446   : > { %v2553_v29 = vpop.xlane.xlu1 %790 }
 0x447   : > { %v1170_v8 = vmul.f32 %v2560_v18, %v1169_v61  ;;  %v806_v26 = vand.u32 2147483648, %v2553_v29  ;;  %vm800_vm13 = vweird.f32 %v2553_v29 }
 0x449   : > { %v1171_v19 = vadd.f32 %v2560_v18, %v1170_v8 }
 0x44b   : > { %v1175_v46 = vsel %vm2601_vm12, %v2560_v18, %v1171_v19 }
 0x44d   : > { %1289 = vadd.xlane.f32.xlu0 %v1288_v20  ;;  %v804_v20 = vand.u32 2147483647, %v2553_v29 }
 0x44e   : > { %v2564_v41 = vpop.xlane.xlu1 %793 }
 0x44f   : > { %v821_v61 = vand.u32 2147483648, %v2564_v41 }
 0x472   : > { %v543_v35 = vpop.xlane.xlu0 %542 }
 0x473   : > { %1852 = vrcp.f32 %v543_v35  ;;  %v2557_v36 = vpop.xlane.xlu2 %1041  ;;  %v730_v37 = vpop.f32.mrf.mxu1  ;;  %v558_v52 = vand.u32 2147483648, %v543_v35  ;;  %v556_v54 = vand.u32 2147483647, %v543_v35  ;;  %vm552_vm15 = vweird.f32 %v543_v35 }
 0x474   : > { %1854 = vrcp.f32 %v2553_v29  ;;  %1366 = vrot.lane.b32.xlu2 %v730_v37, %s2084_s7 }
 0x475   : > { %v559_v59 = vor.u32 1.1754944e-38, %v558_v52  ;;  %vm557_vm4 = vcmp.eq.f32.partialorder %v556_v54, 8.507059e+37 }
 0x479   : > { %v1853_v5 = vpop.eup %1852 }
 0x47a   : > { %v2562_v57 = vpop.eup %1854  ;;  %v548_v38 = vmul.f32 %v1853_v5, %v543_v35  ;;  %v546_v40 = vpop.xlane.xlu0 %545  ;;  %vm553_vm14 = vweird.f32 %v1853_v5 }
 0x47b   : > { %v2566_v12 = vpop.xlane.xlu2 %1165  ;;  %1856 = vrcp.f32 %v546_v40  ;;  %v733_v28 = vpop.f32.mrf.mxu1  ;;  %v796_v50 = vmul.f32 %v2562_v57, %v2553_v29  ;;  %vm554_vm3 = vmor %vm552_vm15, %vm553_vm14  ;;  %v573_v10 = vand.u32 2147483648, %v546_v40  ;;  %v571_v15 = vand.u32 2147483647, %v546_v40 }
 0x47c   : > { %v549_v43 = vsub.f32 1.0, %v548_v38  ;;  %1368 = vrot.lane.b32.xlu2 %v733_v28, %s2084_s7  ;;  %1858 = vrcp.f32 %v2564_v41  ;;  %v2575_v0 = vpop.xlane.xlu1 %1038  ;;  %vm567_vm7 = vweird.f32 %v546_v40  ;;  %vm801_vm9 = vweird.f32 %v2562_v57  ;;  %s2010_s7 = scalar_lea.hbm %s2755_s5, 32 }
 0x47d   : > { %1860 = vrcp.f32 %v2566_v12  ;;  %v797_v51 = vsub.f32 1.0, %v796_v50  ;;  %v574_v63 = vor.u32 1.1754944e-38, %v573_v10  ;;  %vm572_vm11 = vcmp.eq.f32.partialorder %v571_v15, 8.507059e+37  ;;  %vm2611_vm14 = vmor %vm800_vm13, %vm801_vm9 }
 0x47e   : > { %v550_v53 = vmul.f32 %v1853_v5, %v549_v43  ;;  %1862 = vrcp.f32 %v2575_v0  ;;  %v1179_v43 = vor.u32 1.1754944e-38, %v1178_v13  ;;  %v807_v28 = vor.u32 1.1754944e-38, %v806_v26 }
 0x47f   : > { %v798_v9 = vmul.f32 %v2562_v57, %v797_v51  ;;  %1864 = vrcp.f32 %v2557_v36  ;;  %vm1177_vm15 = vcmp.eq.f32.partialorder %v1176_v21, 8.507059e+37  ;;  %v1191_v10 = vand.u32 2147483647, %v2566_v12 }
 0x480   : > { %v551_v58 = vadd.f32 %v1853_v5, %v550_v53  ;;  %v1180_v18 = vsel %vm1177_vm15, %v1179_v43, %v1175_v46  ;;  %vm1048_vm13 = vweird.f32 %v2575_v0 }
 0x481   : > { %v1857_v60 = vpop.eup %1856  ;;  %v799_v22 = vadd.f32 %v2562_v57, %v798_v9  ;;  %v1181_v8 = vmul.f32 %v2474_v48, %v1180_v18  ;;  %v822_v48 = vor.u32 1.1754944e-38, %v821_v61 }
 0x482   : > { %v555_v62 = vsel %vm554_vm3, %v1853_v5, %v551_v58  ;;  %v563_v1 = vmul.f32 %v1857_v60, %v546_v40  ;;  %v2577_v3 = vpop.eup %1858  ;;  %vm568_vm5 = vweird.f32 %v1857_v60  ;;  %vm805_vm3 = vcmp.eq.f32.partialorder %v804_v20, 8.507059e+37 }
 0x483   : > { %v560_v2 = vsel %vm557_vm4, %v559_v59, %v555_v62  ;;  %v2580_v6 = vpop.eup %1860  ;;  %v811_v11 = vmul.f32 %v2577_v3, %v2564_v41  ;;  %vm569_vm10 = vmor %vm567_vm7, %vm568_vm5  ;;  %v803_v29 = vsel %vm2611_vm14, %v2562_v57, %v799_v22  ;;  %v1797_v54 = vpop.permute.xlu2 %1796  ;;  %vm816_vm4 = vweird.f32 %v2577_v3 }
 0x484   : > { %v561_v4 = vmul.f32 %v2498_v39, %v560_v2  ;;  %v564_v7 = vsub.f32 1.0, %v563_v1  ;;  %v1183_v39 = vmul.f32 %v2580_v6, %v2566_v12  ;;  %v2595_v25 = vpop.eup %1862  ;;  %v808_v52 = vsel %vm805_vm3, %v807_v28, %v803_v29 }
 0x485   : > { %v812_v23 = vsub.f32 1.0, %v811_v11  ;;  %vm815_vm5 = vweird.f32 %v2564_v41  ;;  %vm1188_vm6 = vweird.f32 %v2580_v6  ;;  %v1193_v62 = vand.u32 2147483648, %v2566_v12 }
 0x486   : > { %1621 = vmatmul.msk.f32.vlgmr.msrb.gmra.mxu2 %vm404_vm2, %v561_v4  ;;  %v565_v14 = vmul.f32 %v1857_v60, %v564_v7  ;;  %v1184_v27 = vsub.f32 1.0, %v1183_v39  ;;  %v809_v2 = vmul.f32 %v2479_v55, %v808_v52  ;;  %v819_v4 = vand.u32 2147483647, %v2564_v41  ;;  %vm2640_vm8 = vmor %vm815_vm5, %vm816_vm4 }
 0x487   : > { %v813_v40 = vmul.f32 %v2577_v3, %v812_v23  ;;  %vm1187_vm7 = vweird.f32 %v2566_v12  ;;  %v1798_v7 = vunpack.i.l.bf16 %v1797_v54  ;;  %v1799_v41 = vunpack.i.h.bf16 %v1797_v54 }
 0x488   : > { %v566_v16 = vadd.f32 %v1857_v60, %v565_v14  ;;  %v1185_v45 = vmul.f32 %v2580_v6, %v1184_v27  ;;  %vm1189_vm9 = vmor %vm1187_vm7, %vm1188_vm6  ;;  %v1194_v15 = vor.u32 1.1754944e-38, %v1193_v62  ;;  %vm1049_vm12 = vweird.f32 %v2595_v25 }
 0x489   : > { %v814_v59 = vadd.f32 %v2577_v3, %v813_v40  ;;  %v1052_v22 = vand.u32 2147483647, %v2575_v0  ;;  %vm1050_vm14 = vmor %vm1048_vm13, %vm1049_vm12  ;;  %vm1063_vm4 = vweird.f32 %v2557_v36 }
 0x48a   : > { %v570_v24 = vsel %vm569_vm10, %v1857_v60, %v566_v16  ;;  %v2629_v60 = vpop.eup %1864  ;;  %v1186_v51 = vadd.f32 %v2580_v6, %v1185_v45  ;;  %vm820_vm10 = vcmp.eq.f32.partialorder %v819_v4, 8.507059e+37 }
 0x48b   : > { %v575_v30 = vsel %vm572_vm11, %v574_v63, %v570_v24  ;;  %v1059_v11 = vmul.f32 %v2629_v60, %v2557_v36  ;;  %v818_v55 = vsel %vm2640_vm8, %v2577_v3, %v814_v59  ;;  %vm1192_vm11 = vcmp.eq.f32.partialorder %v1191_v10, 8.507059e+37 }
 0x48c   : > { %v576_v37 = vmul.f32 %v2510_v44, %v575_v30  ;;  %v1044_v44 = vmul.f32 %v2595_v25, %v2575_v0  ;;  %v1190_v12 = vsel %vm1189_vm9, %v2580_v6, %v1186_v51  ;;  %v823_v39 = vsel %vm820_vm10, %v822_v48, %v818_v55  ;;  %v1437_v55 = vld [vmem:[#allocation8 + $0x30] sm:$0xff]  ;;  %v1436_v48 = vld [vmem:[#allocation8 + $0x28] sm:$0xff] }
 0x48d   : > { %v1787_v35 = vpop.permute.xlu0 %1786  ;;  %v1060_v16 = vsub.f32 1.0, %v1059_v11  ;;  %v1195_v3 = vsel %vm1192_vm11, %v1194_v15, %v1190_v12  ;;  %v1054_v63 = vand.u32 2147483648, %v2575_v0  ;;  %v824_v23 = vmul.f32 %v2483_v56, %v823_v39  ;;  %v1434_v12 = vld [vmem:[#allocation8 + $0x18] sm:$0xff]  ;;  %v1433_v15 = vld [vmem:[#allocation8 + $0x10] sm:$0xff] }
 0x48e   : > { %v1788_v38 = vunpack.i.l.bf16 %v1787_v35  ;;  %1622 = vmatmul.msk.f32.gmra.mxu2 %vm404_vm2, %v576_v37  ;;  %v1789_v50 = vunpack.i.h.bf16 %v1787_v35  ;;  %v1045_v57 = vsub.f32 1.0, %v1044_v44  ;;  %v1196_v24 = vmul.f32 %v2512_v47, %v1195_v3 }
 0x48f   : > { %v1061_v13 = vmul.f32 %v2629_v60, %v1060_v16  ;;  %v1055_v27 = vor.u32 1.1754944e-38, %v1054_v63  ;;  %vm1053_vm15 = vcmp.eq.f32.partialorder %v1052_v22, 8.507059e+37  ;;  %vm1064_vm3 = vweird.f32 %v2629_v60  ;;  %v1432_v16 = vld [vmem:[#allocation8 + $0x8] sm:$0xff] }
 0x490   : > { %1099 = vmatpush.msrb.mxu2 %v1788_v38  ;;  %v1046_v14 = vmul.f32 %v2595_v25, %v1045_v57  ;;  %v1069_v56 = vand.u32 2147483648, %v2557_v36  ;;  %vm1065_vm5 = vmor %vm1063_vm4, %vm1064_vm3  ;;  %vm1419_vm3 = vcmask 261120   ;;  %vm1422_vm4 = vcmask 326656  }
 0x491   : > { %v1062_v0 = vadd.f32 %v2629_v60, %v1061_v13 }
 0x492   : > { %v1802_v53 = vpop.permute.xlu1 %1801  ;;  %1100 = vmatpush.msrb.mxu2 %v1789_v50  ;;  %v1047_v19 = vadd.f32 %v2595_v25, %v1046_v14  ;;  %v1070_v21 = vor.u32 1.1754944e-38, %v1069_v56  ;;  %v1438_v14 = vld [vmem:[#allocation8 + $0x38] sm:$0xff] }
 0x493   : > { %v1803_v58 = vunpack.i.l.bf16 %v1802_v53  ;;  %v1804_v1 = vunpack.i.h.bf16 %v1802_v53  ;;  %v1066_v32 = vsel %vm1065_vm5, %v2629_v60, %v1062_v0  ;;  %1457 = vmatpush.msra.mxu0 %v1438_v14  ;;  %vm1425_vm5 = vcmask 392192  }
 0x494   : > { %v1051_v26 = vsel %vm1050_vm14, %v2595_v25, %v1047_v19  ;;  %v1067_v25 = vand.u32 2147483647, %v2557_v36  ;;  %v1431_v19 = vld [vmem:[#allocation8] sm:$0xff] }
 0x495   : > { %1223 = vmatpush.msra.mxu1 %v1803_v58  ;;  %v1056_v30 = vsel %vm1053_vm15, %v1055_v27, %v1051_v26  ;;  %1458 = vmatpush.msra.mxu0 %v1437_v55  ;;  %vm1416_vm15 = vcmask 195584  }
 0x496   : > { %1633 = vmatmul.msk.f32.vlgmr.msra.gmra.mxu2 %vm404_vm2, %v809_v2  ;;  %v1057_v47 = vmul.f32 %v2514_v49, %v1056_v30  ;;  %vm1068_vm6 = vcmp.eq.f32.partialorder %v1067_v25, 8.507059e+37 }
 0x497   : > { %1224 = vmatpush.msra.mxu1 %v1804_v1  ;;  %1347 = vmatpush.msra.mxu2 %v1798_v7  ;;  %v1071_v20 = vsel %vm1068_vm6, %v1070_v21, %v1066_v32  ;;  %vm1428_vm6 = vcmask 457728  }
 0x498   : > { %1651 = vmatmul.msk.f32.vlgmr.msra.gmra.mxu1 %vm404_vm2, %v1181_v8  ;;  %v1072_v35 = vmul.f32 %v2502_v42, %v1071_v20  ;;  %1459 = vmatpush.msra.mxu0 %v1436_v48 }
 0x499   : > { %1348 = vmatpush.msra.mxu2 %v1799_v41  ;;  %v1435_v41 = vld [vmem:[#allocation8 + $0x20] sm:$0xff] }
 0x49a   : > { %1460 = vmatpush.msra.mxu0 %v1435_v41 }
 0x49c   : > { %1461 = vmatpush.msra.mxu0 %v1434_v12 }
 0x49e   : > { %v978_v6 = vpop.f32.mrf.mxu1  ;;  %1634 = vmatmul.msk.f32.gmra.mxu2 %vm404_vm2, %v824_v23  ;;  %1462 = vmatpush.msra.mxu0 %v1433_v15 }
 0x49f   : > { %1382 = vrot.lane.b32.xlu0 %v978_v6, %s2082_s9 }
 0x4a0   : > { %1652 = vmatmul.msk.f32.gmra.mxu1 %vm404_vm2, %v1196_v24  ;;  %1463 = vmatpush.msra.mxu0 %v1432_v16 }
 0x4a2   : > { %1464 = vmatpush.msra.mxu0 %v1431_v19 }
 0x4a6   : > { %1645 = vmatmul.msk.f32.vlgmr.msrb.gmra.mxu2 %vm404_vm2, %v1057_v47  ;;  %v981_v1 = vpop.f32.mrf.mxu1 }
 0x4ae   : > { %1646 = vmatmul.msk.f32.gmra.mxu2 %vm404_vm2, %v1072_v35 }
 0x4b8   : > { %v1287_v37 = vpop.xlane.xlu0 %1286 }
 0x4b9   : > { %1866 = vrcp.f32 %v1287_v37  ;;  %v1302_v36 = vand.u32 2147483648, %v1287_v37  ;;  %v1300_v40 = vand.u32 2147483647, %v1287_v37  ;;  %vm1296_vm8 = vweird.f32 %v1287_v37 }
 0x4bb   : > { %v1303_v28 = vor.u32 1.1754944e-38, %v1302_v36  ;;  %vm1301_vm10 = vcmp.eq.f32.partialorder %v1300_v40, 8.507059e+37 }
 0x4bf   : > { %v1867_v5 = vpop.eup %1866 }
 0x4c0   : > { %v1292_v38 = vmul.f32 %v1867_v5, %v1287_v37  ;;  %v1290_v46 = vpop.xlane.xlu0 %1289  ;;  %vm1297_vm7 = vweird.f32 %v1867_v5 }
 0x4c1   : > { %1868 = vrcp.f32 %v1290_v46  ;;  %vm1298_vm9 = vmor %vm1296_vm8, %vm1297_vm7  ;;  %v1317_v53 = vand.u32 2147483648, %v1290_v46  ;;  %v1315_v54 = vand.u32 2147483647, %v1290_v46  ;;  %vm1311_vm12 = vweird.f32 %v1290_v46 }
 0x4c2   : > { %v1293_v49 = vsub.f32 1.0, %v1292_v38 }
 0x4c3   : > { %v1318_v59 = vor.u32 1.1754944e-38, %v1317_v53  ;;  %vm1316_vm14 = vcmp.eq.f32.partialorder %v1315_v54, 8.507059e+37 }
 0x4c4   : > { %v1294_v29 = vmul.f32 %v1867_v5, %v1293_v49 }
 0x4c6   : > { %v1295_v44 = vadd.f32 %v1867_v5, %v1294_v29 }
 0x4c7   : > { %v1869_v43 = vpop.eup %1868 }
 0x4c8   : > { %v1299_v45 = vsel %vm1298_vm9, %v1867_v5, %v1295_v44  ;;  %v1307_v42 = vmul.f32 %v1869_v43, %v1290_v46  ;;  %vm1312_vm11 = vweird.f32 %v1869_v43 }
 0x4c9   : > { %v1304_v50 = vsel %vm1301_vm10, %v1303_v28, %v1299_v45  ;;  %vm1313_vm13 = vmor %vm1311_vm12, %vm1312_vm11 }
 0x4ca   : > { %v1308_v18 = vsub.f32 1.0, %v1307_v42  ;;  %v1305_v52 = vmul.f32 %v2543_v17, %v1304_v50 }
 0x4cc   : > { %v1309_v57 = vmul.f32 %v1869_v43, %v1308_v18  ;;  %1657 = vmatmul.msk.f32.vlgmr.msra.gmra.mxu2 %vm404_vm2, %v1305_v52 }
 0x4ce   : > { %v1310_v58 = vadd.f32 %v1869_v43, %v1309_v57  ;;  %v1367_v3 = vpop.permute.xlu2 %1366 }
 0x4d0   : > { %v1314_v60 = vsel %vm1313_vm13, %v1869_v43, %v1310_v58 }
 0x4d1   : > { %v1319_v61 = vsel %vm1316_vm14, %v1318_v59, %v1314_v60 }
 0x4d2   : > { %v1320_v51 = vmul.f32 %v2547_v33, %v1319_v61 }
 0x4d4   : > { %1658 = vmatmul.msk.f32.gmra.mxu2 %vm404_vm2, %v1320_v51 }
 0x4d6   : > { %v1369_v23 = vpop.permute.xlu2 %1368 }
 0x509   : > { %v606_v62 = vpop.f32.mrf.mxu2 }
 0x511   : > { %v609_v17 = vpop.f32.mrf.mxu2  ;;  %v1383_v30 = vpop.permute.xlu0 %1382 }
 0x515   : > { %v1226_v2 = vpop.f32.mrf.mxu1 }
 0x516   : > { %1398 = vrot.lane.b32.xlu1 %v1226_v2, %s2080_s14 }
 0x519   : > { %v854_v4 = vpop.f32.mrf.mxu2 }
 0x51d   : > { %v1229_v8 = vpop.f32.mrf.mxu1 }
 0x51e   : > { %1358 = vrot.lane.b32.xlu1 %v606_v62, %s2085_s24 }
 0x521   : > { %v857_v7 = vpop.f32.mrf.mxu2 }
 0x522   : > { %1376 = vrot.lane.b32.xlu0 %v857_v7, %s2083_s30 }
 0x526   : > { %1360 = vrot.lane.b32.xlu1 %v609_v17, %s2085_s24 }
 0x529   : > { %v1102_v9 = vpop.f32.mrf.mxu2 }
 0x52a   : > { %1400 = vrot.lane.b32.xlu0 %v1229_v8, %s2080_s14  ;;  %1390 = vrot.lane.b32.xlu2 %v1102_v9, %s2081_s15  ;;  %s1489_s14 = sshll.u32 %s1486_s13, 4  ;;  %s1490_s14 = int_to_ptr.hbm [resolvable:$true] %s1489_s14 }
 0x52e   : > { %1374 = vrot.lane.b32.xlu1 %v854_v4, %s2083_s30 }
 0x531   : > { %v1105_v33 = vpop.f32.mrf.mxu2 }
 0x536   : > { %1384 = vrot.lane.b32.xlu1 %v981_v1, %s2082_s9  ;;  %s2004_s9 = sshra.s32 %s1490_s14, 4  ;;  %s2005_s9 = int_to_ptr.hbm [resolvable:$true] %s2004_s9 }
 0x537   : > { %s2006_s11 = scalar_lea.hbm %s2005_s9, 16  ;;  %p2011_p11 = scmp.lt.s32.totalorder %s2005_s9, %s2755_s5 }
 0x538   : > { %p2007_p1 = scmp.ne.s32.totalorder %s2005_s9, %s2006_s11  ;;  %p2012_p9 = scmp.lt.s32.totalorder %s2010_s7, %s2006_s11 }
 0x53a   : > { %p2008_p4 = pnand %p2007_p1, %p2208_p3  ;;  %p2013_p2 = por %p2012_p9, %p2011_p11 }
 0x53c   : > { %p2009_p8 = pneg %p2008_p4 }
 0x53e   : > { %p2014_p10 = pnand %p2013_p2, %p2009_p8 }
 0x54f   : > { %v1350_v10 = vpop.f32.mrf.mxu2 }
 0x550   : > { %1406 = vrot.lane.b32.xlu2 %v1350_v10, %s2079_s10 }
 0x557   : > { %v1353_v11 = vpop.f32.mrf.mxu2 }
 0x558   : > { %1392 = vrot.lane.b32.xlu2 %v1105_v33, %s2081_s15  ;;  %1408 = vrot.lane.b32.xlu1 %v1353_v11, %s2079_s10  ;;  %s1487_s10 = sshll.u32 %s294_s16, 4  ;;  %s1475_s15 = scalar_lea.sflag [#allocation4], %s2238_s17  ;;  %s1488_s10 = int_to_ptr.vmem [resolvable:$true] %s1487_s10 }
 0x584   : > { %v1391_v27 = vpop.permute.xlu2 %1390 }
 0x588   : > { %v1399_v39 = vpop.permute.xlu1 %1398 }
 0x590   : > { %v1359_v63 = vpop.permute.xlu1 %1358 }
 0x591   : > { %v1412_v6 = vsel %vm366_vm1, %v2398_v31, %v1359_v63 }
 0x592   : > { %v1414_v24 = vsel %vm404_vm2, %v1412_v6, %v1367_v3 }
 0x594   : > { %v1377_v32 = vpop.permute.xlu0 %1376 }
 0x598   : > { %v1361_v22 = vpop.permute.xlu1 %1360 }
 0x599   : > { %v1413_v21 = vsel %vm366_vm1, %v2400_v34, %v1361_v22  ;;  %v1805_v34 = vld [vmem:[%s2754_s4] ss:$0 sm:$0xff] }
 0x59a   : > { %v1415_v20 = vsel %vm404_vm2, %v1413_v21, %v1369_v23 }
 0x59b   : > { %v1418_v5 = vsel %vm1416_vm15, %v1415_v20, %v1377_v32 }
 0x59c   : > { %v1401_v49 = vpop.permute.xlu0 %1400 }
 0x5a0   : > { %v1375_v13 = vpop.permute.xlu1 %1374 }
 0x5a1   : > { %v1417_v26 = vsel %vm1416_vm15, %v1414_v24, %v1375_v13 }
 0x5a2   : > { %v1420_v0 = vsel %vm1419_vm3, %v1417_v26, %v1383_v30 }
 0x5a3   : > { %v1423_v56 = vsel %vm1422_vm4, %v1420_v0, %v1391_v27 }
 0x5a4   : > { %v1426_v47 = vsel %vm1425_vm5, %v1423_v56, %v1399_v39 }
 0x5a8   : > { %v1385_v35 = vpop.permute.xlu1 %1384 }
 0x5a9   : > { %v1421_v38 = vsel %vm1419_vm3, %v1418_v5, %v1385_v35 }
 0x5aa   : > { %v1407_v25 = vpop.permute.xlu2 %1406 }
 0x5ab   : > { %v1429_v31 = vsel %vm1428_vm6, %v1426_v47, %v1407_v25 }
 0x5ac   : > { %1659 = vmatmul.msk.f32.vlgmr.msra.gmra.mxu0 %vm305_vm0, %v1429_v31 }
 0x5b2   : > { %v1393_v37 = vpop.permute.xlu2 %1392 }
 0x5b3   : > { %v1424_v46 = vsel %vm1422_vm4, %v1421_v38, %v1393_v37 }
 0x5b4   : > { %v1427_v29 = vsel %vm1425_vm5, %v1424_v46, %v1401_v49 }
 0x5ca   : > { %v1409_v36 = vpop.permute.xlu1 %1408 }
 0x5cb   : > { %v1430_v40 = vsel %vm1428_vm6, %v1427_v29, %v1409_v36 }
 0x5cc   : > { %1660 = vmatmul.msk.f32.gmra.mxu0 %vm305_vm0, %v1430_v40 }
 0x629   : > { %v1466_v44 = vpop.f32.mrf.mxu0 }
 0x62a   : > { %v1467_v43 = vadd.f32 %v1805_v34, %v1466_v44 }
 0x62c   : > { %1472 = vst.msk [vmem:[%s294_s16] sm:$0xff] %vm305_vm0, %v1467_v43 }
 0x649   : > { %v1469_v28 = vpop.f32.mrf.mxu0 }
 0x64a   : > { %v1470_v45 = vadd.f32 %v1805_v34, %v1469_v28 }
 0x64c   : > { %1473 = vst.msk [vmem:[%s294_s16 + $0x8] sm:$0xff] %vm305_vm0, %v1470_v45 }
 0x64d   : > { %2017 = shalt.err (!%p2014_p10)
}
 0x64e   : > { %s2086_s17 = smov 128  }
 0x64f   : > { %1684 = dma.vmem_to_hbm [thread:$0]  (%p2208_p3), %s1488_s10, 256, %s1490_s14, %s1475_s15, %s2086_s17, %s2086_s17, %s2085_s24  }
 0x650 PF: > { %s1504_s16 = sand.u32 1, %s2052_s18   ;;  %p2770_p12 = scmp.ge.s32.totalorder %s2064_s21, 2 }
 0x651   : > { %s1505_s23 = scalar_lea.sflag [#allocation4], %s1504_s16 }
 0x652   : > { %p1701_p13 = pnand %p2770_p12, %p2152_p6 }
 0x654   : > { %p1702_p0 = pneg %p1701_p13 }
 0x656   : > { %2047 = dma.done.wait (%p1702_p0), %s1505_s23, 256  }
 0x657   : > { %2049 = vsyncadd (%p1702_p0), %s1505_s23, 4294967040  ;;  %p20_p5 = scmp.ge.s32.totalorder %s2190_s27, 4   ;;  %s2771_s18 = smov %s2056_s19 }
 0x658   : > { %s2772_s19 = smov %s2060_s20  ;;  %s2773_s20 = smov %s2204_s6 }
 0x659   : > { %s2774_s21 = smov %s2190_s27  ;;  %22 = sbr.rel (!%p20_p5) target bundleno = 7 (0x7), region = 97 }
 0x65e   :  { %1511 = vsyncpa [#allocation3], 1 }
 0x65f   :  { %1513 = vsyncpa [#allocation3 + $0x1], 1 }
 0x660   :  { %1514 = vsyncpa [#allocation6], 1 }
 0x661   :  { %1515 = vsyncpa [#allocation9], 1 }
 0x662   :  { %1516 = vsyncpa [#allocation4], 1 }
 0x663   :  { %1518 = vsyncpa [#allocation4 + $0x1], 1 }

</bundles_post_ra>
